<compile_context>
chip_gen: v6e
topology: v6e:2x2x1
jax: 0.10.0
libtpu: 0.0.40
codegen_flags: <defaults>
</compile_context>

<pallas_src>
import jax
import jax.numpy as jnp
from jax.experimental import pallas as pl
from jax.experimental.pallas import tpu as pltpu

INPUT_SIZE = 512
HIDDEN_SIZE = 256
MAX_TB = 512  # max batch tile (rows); f32 tiles stay well inside scoped VMEM


def _round_up(n, m):
    return ((n + m - 1) // m) * m


def _pick_tb(batch):
    """Pick the batch tile: big enough to amortize per-step overhead, small
    enough for VMEM on all generations, and (when B > 8) leaving >= 2 grid
    steps so v7x's two TensorCores can both be used."""
    if batch <= 8:
        return 8
    half = _round_up(pl.cdiv(batch, 2), 8)
    return min(MAX_TB, half)


def autoencoder_kernel(x_ref, w1_ref, b1_ref, w2_ref, b2_ref, o_ref):
    x = x_ref[...]                                                    # (TB, 512)
    # encoder: Linear(512->256) + ReLU  (Dropout is identity at inference)
    h = jnp.dot(x, w1_ref[...], preferred_element_type=jnp.float32) + b1_ref[...]
    h = jnp.maximum(h, 0.0)                                           # (TB, 256) f32
    # decoder: Linear(256->512) + ReLU
    # cast h to the weight dtype so the bf16 path keeps the MXU at bf16 rate.
    d = jnp.dot(h.astype(w2_ref.dtype), w2_ref[...],
                preferred_element_type=jnp.float32) + b2_ref[...]
    d = jnp.maximum(d, 0.0)                                           # (TB, 512) f32
    # softmax over last dim, in f32 (nn.Softmax() on 2-D input -> dim=1)
    m = jnp.max(d, axis=-1, keepdims=True)
    e = jnp.exp(d - m)
    inv = pl.reciprocal(jnp.sum(e, axis=-1, keepdims=True), approx=True)
    o_ref[...] = (e * inv).astype(o_ref.dtype)


def _make_call(grid_b, tb, single_buffer_weights):
    # Weights/biases are grid-invariant; single-buffer them to save VMEM.
    wkw = dict(pipeline_mode=pl.Buffered(1)) if single_buffer_weights else {}
    return pl.pallas_call(
        autoencoder_kernel,
        out_shape=jax.ShapeDtypeStruct((grid_b * tb, INPUT_SIZE), jnp.float32),
        grid_spec=pltpu.PrefetchScalarGridSpec(
            num_scalar_prefetch=0,
            grid=(grid_b,),
            in_specs=[
                pl.BlockSpec((tb, INPUT_SIZE), lambda i: (i, 0)),                  # x tile
                pl.BlockSpec((INPUT_SIZE, HIDDEN_SIZE), lambda i: (0, 0), **wkw),  # W1
                pl.BlockSpec((1, HIDDEN_SIZE), lambda i: (0, 0), **wkw),           # b1
                pl.BlockSpec((HIDDEN_SIZE, INPUT_SIZE), lambda i: (0, 0), **wkw),  # W2
                pl.BlockSpec((1, INPUT_SIZE), lambda i: (0, 0), **wkw),            # b2
            ],
            out_specs=pl.BlockSpec((tb, INPUT_SIZE), lambda i: (i, 0)),
        ),
        compiler_params=pltpu.CompilerParams(
            dimension_semantics=("parallel",)),
    )


def autoencoder_forward(x, w1, b1, w2, b2, *, use_bf16=False):
    B, D = x.shape
    assert D == INPUT_SIZE
    if use_bf16:
        # bf16 matmul operands (native MXU rate, half the HBM traffic);
        # accumulation / bias / ReLU / softmax stay in f32 inside the kernel.
        x = x.astype(jnp.bfloat16)
        w1 = w1.astype(jnp.bfloat16)
        w2 = w2.astype(jnp.bfloat16)
    b1 = b1.astype(jnp.float32)
    b2 = b2.astype(jnp.float32)

    tb = _pick_tb(B)
    b_pad = _round_up(B, tb)
    if b_pad != B:
        x = jnp.pad(x, ((0, b_pad - B), (0, 0)))
    grid_b = b_pad // tb

    try:
        out = _make_call(grid_b, tb, True)(x, w1, b1, w2, b2)
    except Exception:
        # pipeline_mode / pl.Buffered(1) unsupported -> default double-buffering.
        out = _make_call(grid_b, tb, False)(x, w1, b1, w2, b2)

    return out[:B] if b_pad != B else out


def init_params(key):
    """Deterministic params; shapes mirror nn.Linear (stored transposed)."""
    k1, k2, k3, k4 = jax.random.split(key, 4)
    lim1 = 1.0 / jnp.sqrt(INPUT_SIZE)
    lim2 = 1.0 / jnp.sqrt(HIDDEN_SIZE)
    w1 = jax.random.uniform(k1, (INPUT_SIZE, HIDDEN_SIZE), jnp.float32, -lim1, lim1)
    b1 = jax.random.uniform(k2, (1, HIDDEN_SIZE), jnp.float32, -lim1, lim1)
    w2 = jax.random.uniform(k3, (HIDDEN_SIZE, INPUT_SIZE), jnp.float32, -lim2, lim2)
    b2 = jax.random.uniform(k4, (1, INPUT_SIZE), jnp.float32, -lim2, lim2)
    return w1, b1, w2, b2


def _reference(x, w1, b1, w2, b2):
    h = jnp.maximum(x @ w1 + b1, 0.0)
    d = jnp.maximum(h @ w2 + b2, 0.0)
    return jax.nn.softmax(d, axis=-1)


if __name__ == "__main__":
    key = jax.random.PRNGKey(0)
    kx, kp = jax.random.split(key)
    w1, b1, w2, b2 = init_params(kp)

    # f32 path: small batches, including one that is not a multiple of the tile.
    for B in (16, 13):
        x = jax.random.normal(jax.random.fold_in(kx, B), (B, INPUT_SIZE), dtype=jnp.float32)
        out = autoencoder_forward(x, w1, b1, w2, b2)
        jax.block_until_ready(out)
        ref = _reference(x, w1, b1, w2, b2)
        assert out.shape == (B, INPUT_SIZE)
        assert jnp.allclose(out, ref, atol=1e-4, rtol=2e-3), \
            float(jnp.max(jnp.abs(out - ref)))

    # bf16 matmul path (looser tolerance vs. f32 reference).
    x = jax.random.normal(kx, (16, INPUT_SIZE), dtype=jnp.float32)
    out_bf16 = autoencoder_forward(x, w1, b1, w2, b2, use_bf16=True)
    jax.block_until_ready(out_bf16)
    ref = _reference(x, w1, b1, w2, b2)
    assert jnp.allclose(out_bf16, ref, atol=5e-3, rtol=1e-1), \
        float(jnp.max(jnp.abs(out_bf16 - ref)))

    # TODO(synk): training-mode Dropout(0.2) would need pltpu.prng_random_bits; omitted (eval semantics).
    print("KERNEL_OK")
</pallas_src>

<mosaic_0001>
module attributes {stable_mosaic.version = 11 : i64} {
  func.func @autoencoder_kernel(%arg0: i32, %arg1: memref<8x512xf32, #tpu.memory_space<vmem>>, %arg2: memref<512x256xf32, #tpu.memory_space<vmem>>, %arg3: memref<1x256xf32, #tpu.memory_space<vmem>>, %arg4: memref<256x512xf32, #tpu.memory_space<vmem>>, %arg5: memref<1x512xf32, #tpu.memory_space<vmem>>, %arg6: memref<8x512xf32, #tpu.memory_space<vmem>>) attributes {dimension_semantics = [#tpu.dimension_semantics<parallel>], iteration_bounds = array<i64: 2>, scalar_prefetch = 0 : i64, scratch_operands = 0 : i64, tpu.core_type = #tpu.core_type<tc>, window_params = [{transform_indices = @transform_0, window_bounds = array<i64: 8, 512>}, {pipeline_mode = #tpu.pipeline_mode<synchronous>, transform_indices = @transform_1, window_bounds = array<i64: 512, 256>}, {pipeline_mode = #tpu.pipeline_mode<synchronous>, transform_indices = @transform_2, window_bounds = array<i64: 1, 256>}, {pipeline_mode = #tpu.pipeline_mode<synchronous>, transform_indices = @transform_3, window_bounds = array<i64: 256, 512>}, {pipeline_mode = #tpu.pipeline_mode<synchronous>, transform_indices = @transform_4, window_bounds = array<i64: 1, 512>}, {transform_indices = @transform_5, window_bounds = array<i64: 8, 512>}]} {
    %c0 = arith.constant 0 : index
    %c0_0 = arith.constant 0 : index
    %0 = vector.load %arg1[%c0, %c0_0] : memref<8x512xf32, #tpu.memory_space<vmem>>, vector<8x512xf32>
    %c0_1 = arith.constant 0 : index
    %c0_2 = arith.constant 0 : index
    %1 = vector.load %arg2[%c0_1, %c0_2] : memref<512x256xf32, #tpu.memory_space<vmem>>, vector<512x256xf32>
    %cst = arith.constant dense<0.000000e+00> : vector<8x256xf32>
    %2 = tpu.matmul %0, %1, %cst {dimension_numbers = #tpu.dot_dimension_numbers<[1], [0], [0], [1], [0, 0, 1, 1], [], []>} : vector<8x512xf32>, vector<512x256xf32>, vector<8x256xf32> -> vector<8x256xf32>
    %c0_3 = arith.constant 0 : index
    %c0_4 = arith.constant 0 : index
    %3 = vector.load %arg3[%c0_3, %c0_4] : memref<1x256xf32, #tpu.memory_space<vmem>>, vector<1x256xf32>
    %4 = vector.broadcast %3 : vector<1x256xf32> to vector<8x256xf32>
    %5 = arith.addf %2, %4 : vector<8x256xf32>
    %cst_5 = arith.constant 0.000000e+00 : f32
    %6 = vector.broadcast %cst_5 : f32 to vector<8x256xf32>
    %7 = arith.maximumf %5, %6 : vector<8x256xf32>
    %c0_6 = arith.constant 0 : index
    %c0_7 = arith.constant 0 : index
    %8 = vector.load %arg4[%c0_6, %c0_7] : memref<256x512xf32, #tpu.memory_space<vmem>>, vector<256x512xf32>
    %cst_8 = arith.constant dense<0.000000e+00> : vector<8x512xf32>
    %9 = tpu.matmul %7, %8, %cst_8 {dimension_numbers = #tpu.dot_dimension_numbers<[1], [0], [0], [1], [0, 0, 1, 1], [], []>} : vector<8x256xf32>, vector<256x512xf32>, vector<8x512xf32> -> vector<8x512xf32>
    %c0_9 = arith.constant 0 : index
    %c0_10 = arith.constant 0 : index
    %10 = vector.load %arg5[%c0_9, %c0_10] : memref<1x512xf32, #tpu.memory_space<vmem>>, vector<1x512xf32>
    %11 = vector.broadcast %10 : vector<1x512xf32> to vector<8x512xf32>
    %12 = arith.addf %9, %11 : vector<8x512xf32>
    %cst_11 = arith.constant 0.000000e+00 : f32
    %13 = vector.broadcast %cst_11 : f32 to vector<8x512xf32>
    %14 = arith.maximumf %12, %13 : vector<8x512xf32>
    %cst_12 = arith.constant dense<0xFF800000> : vector<8xf32>
    %15 = vector.multi_reduction <maximumf>, %14, %cst_12 [1] : vector<8x512xf32> to vector<8xf32>
    %16 = vector.shape_cast %15 : vector<8xf32> to vector<8x1xf32>
    %17 = vector.broadcast %16 : vector<8x1xf32> to vector<8x512xf32>
    %18 = arith.subf %14, %17 : vector<8x512xf32>
    %19 = math.exp %18 : vector<8x512xf32>
    %cst_13 = arith.constant dense<0.000000e+00> : vector<8xf32>
    %20 = vector.multi_reduction <add>, %19, %cst_13 [1] : vector<8x512xf32> to vector<8xf32>
    %21 = vector.shape_cast %20 : vector<8xf32> to vector<8x1xf32>
    %22 = tpu.reciprocal %21 {approx = true} : vector<8x1xf32> -> vector<8x1xf32>
    %23 = vector.broadcast %22 : vector<8x1xf32> to vector<8x512xf32>
    %24 = arith.mulf %19, %23 : vector<8x512xf32>
    %c0_14 = arith.constant 0 : index
    %c0_15 = arith.constant 0 : index
    %25 = vector.load %arg6[%c0_14, %c0_15] : memref<8x512xf32, #tpu.memory_space<vmem>>, vector<8x512xf32>
    tpu.vector_store %arg6[%c0_14, %c0_15], %24 {strides = array<i32>} : memref<8x512xf32, #tpu.memory_space<vmem>>, vector<8x512xf32>,
    return
  }
  func.func @transform_0(%arg0: i32) -> (i32, i32) {
    %c0_i32 = arith.constant 0 : i32
    %c0_i32_0 = arith.constant 0 : i32
    return %arg0, %c0_i32 : i32, i32
  }
  func.func @transform_1(%arg0: i32) -> (i32, i32) {
    %c0_i32 = arith.constant 0 : i32
    %c0_i32_0 = arith.constant 0 : i32
    %c0_i32_1 = arith.constant 0 : i32
    return %c0_i32, %c0_i32_0 : i32, i32
  }
  func.func @transform_2(%arg0: i32) -> (i32, i32) {
    %c0_i32 = arith.constant 0 : i32
    %c0_i32_0 = arith.constant 0 : i32
    %c0_i32_1 = arith.constant 0 : i32
    return %c0_i32, %c0_i32_0 : i32, i32
  }
  func.func @transform_3(%arg0: i32) -> (i32, i32) {
    %c0_i32 = arith.constant 0 : i32
    %c0_i32_0 = arith.constant 0 : i32
    %c0_i32_1 = arith.constant 0 : i32
    return %c0_i32, %c0_i32_0 : i32, i32
  }
  func.func @transform_4(%arg0: i32) -> (i32, i32) {
    %c0_i32 = arith.constant 0 : i32
    %c0_i32_0 = arith.constant 0 : i32
    %c0_i32_1 = arith.constant 0 : i32
    return %c0_i32, %c0_i32_0 : i32, i32
  }
  func.func @transform_5(%arg0: i32) -> (i32, i32) {
    %c0_i32 = arith.constant 0 : i32
    %c0_i32_0 = arith.constant 0 : i32
    return %arg0, %c0_i32 : i32, i32
  }
}

module attributes {stable_mosaic.version = 11 : i64} {
  func.func @autoencoder_kernel(%arg0: i32, %arg1: memref<8x512xf32, #tpu.memory_space<vmem>>, %arg2: memref<512x256xf32, #tpu.memory_space<vmem>>, %arg3: memref<1x256xf32, #tpu.memory_space<vmem>>, %arg4: memref<256x512xf32, #tpu.memory_space<vmem>>, %arg5: memref<1x512xf32, #tpu.memory_space<vmem>>, %arg6: memref<8x512xf32, #tpu.memory_space<vmem>>) attributes {dimension_semantics = [#tpu.dimension_semantics<parallel>], iteration_bounds = array<i64: 2>, scalar_prefetch = 0 : i64, scratch_operands = 0 : i64, tpu.core_type = #tpu.core_type<tc>, window_params = [{transform_indices = @transform_0, window_bounds = array<i64: 8, 512>}, {pipeline_mode = #tpu.pipeline_mode<synchronous>, transform_indices = @transform_1, window_bounds = array<i64: 512, 256>}, {pipeline_mode = #tpu.pipeline_mode<synchronous>, transform_indices = @transform_2, window_bounds = array<i64: 1, 256>}, {pipeline_mode = #tpu.pipeline_mode<synchronous>, transform_indices = @transform_3, window_bounds = array<i64: 256, 512>}, {pipeline_mode = #tpu.pipeline_mode<synchronous>, transform_indices = @transform_4, window_bounds = array<i64: 1, 512>}, {transform_indices = @transform_5, window_bounds = array<i64: 8, 512>}]} {
    %c0 = arith.constant 0 : index
    %c0_0 = arith.constant 0 : index
    %0 = vector.load %arg1[%c0, %c0_0] : memref<8x512xf32, #tpu.memory_space<vmem>>, vector<8x512xf32>
    %c0_1 = arith.constant 0 : index
    %c0_2 = arith.constant 0 : index
    %1 = vector.load %arg2[%c0_1, %c0_2] : memref<512x256xf32, #tpu.memory_space<vmem>>, vector<512x256xf32>
    %cst = arith.constant dense<0.000000e+00> : vector<8x256xf32>
    %2 = tpu.matmul %0, %1, %cst {dimension_numbers = #tpu.dot_dimension_numbers<[1], [0], [0], [1], [0, 0, 1, 1], [], []>} : vector<8x512xf32>, vector<512x256xf32>, vector<8x256xf32> -> vector<8x256xf32>
    %c0_3 = arith.constant 0 : index
    %c0_4 = arith.constant 0 : index
    %3 = vector.load %arg3[%c0_3, %c0_4] : memref<1x256xf32, #tpu.memory_space<vmem>>, vector<1x256xf32>
    %4 = vector.broadcast %3 : vector<1x256xf32> to vector<8x256xf32>
    %5 = arith.addf %2, %4 : vector<8x256xf32>
    %cst_5 = arith.constant 0.000000e+00 : f32
    %6 = vector.broadcast %cst_5 : f32 to vector<8x256xf32>
    %7 = arith.maximumf %5, %6 : vector<8x256xf32>
    %c0_6 = arith.constant 0 : index
    %c0_7 = arith.constant 0 : index
    %8 = vector.load %arg4[%c0_6, %c0_7] : memref<256x512xf32, #tpu.memory_space<vmem>>, vector<256x512xf32>
    %cst_8 = arith.constant dense<0.000000e+00> : vector<8x512xf32>
    %9 = tpu.matmul %7, %8, %cst_8 {dimension_numbers = #tpu.dot_dimension_numbers<[1], [0], [0], [1], [0, 0, 1, 1], [], []>} : vector<8x256xf32>, vector<256x512xf32>, vector<8x512xf32> -> vector<8x512xf32>
    %c0_9 = arith.constant 0 : index
    %c0_10 = arith.constant 0 : index
    %10 = vector.load %arg5[%c0_9, %c0_10] : memref<1x512xf32, #tpu.memory_space<vmem>>, vector<1x512xf32>
    %11 = vector.broadcast %10 : vector<1x512xf32> to vector<8x512xf32>
    %12 = arith.addf %9, %11 : vector<8x512xf32>
    %cst_11 = arith.constant 0.000000e+00 : f32
    %13 = vector.broadcast %cst_11 : f32 to vector<8x512xf32>
    %14 = arith.maximumf %12, %13 : vector<8x512xf32>
    %cst_12 = arith.constant dense<0xFF800000> : vector<8xf32>
    %15 = vector.multi_reduction <maximumf>, %14, %cst_12 [1] : vector<8x512xf32> to vector<8xf32>
    %16 = vector.shape_cast %15 : vector<8xf32> to vector<8x1xf32>
    %17 = vector.broadcast %16 : vector<8x1xf32> to vector<8x512xf32>
    %18 = arith.subf %14, %17 : vector<8x512xf32>
    %19 = math.exp %18 : vector<8x512xf32>
    %cst_13 = arith.constant dense<0.000000e+00> : vector<8xf32>
    %20 = vector.multi_reduction <add>, %19, %cst_13 [1] : vector<8x512xf32> to vector<8xf32>
    %21 = vector.shape_cast %20 : vector<8xf32> to vector<8x1xf32>
    %22 = tpu.reciprocal %21 {approx = true} : vector<8x1xf32> -> vector<8x1xf32>
    %23 = vector.broadcast %22 : vector<8x1xf32> to vector<8x512xf32>
    %24 = arith.mulf %19, %23 : vector<8x512xf32>
    %c0_14 = arith.constant 0 : index
    %c0_15 = arith.constant 0 : index
    %25 = vector.load %arg6[%c0_14, %c0_15] : memref<8x512xf32, #tpu.memory_space<vmem>>, vector<8x512xf32>
    tpu.vector_store %arg6[%c0_14, %c0_15], %24 {strides = array<i32>} : memref<8x512xf32, #tpu.memory_space<vmem>>, vector<8x512xf32>,
    return
  }
  func.func @transform_0(%arg0: i32) -> (i32, i32) {
    %c0_i32 = arith.constant 0 : i32
    %c0_i32_0 = arith.constant 0 : i32
    return %arg0, %c0_i32 : i32, i32
  }
  func.func @transform_1(%arg0: i32) -> (i32, i32) {
    %c0_i32 = arith.constant 0 : i32
    %c0_i32_0 = arith.constant 0 : i32
    %c0_i32_1 = arith.constant 0 : i32
    return %c0_i32, %c0_i32_0 : i32, i32
  }
  func.func @transform_2(%arg0: i32) -> (i32, i32) {
    %c0_i32 = arith.constant 0 : i32
    %c0_i32_0 = arith.constant 0 : i32
    %c0_i32_1 = arith.constant 0 : i32
    return %c0_i32, %c0_i32_0 : i32, i32
  }
  func.func @transform_3(%arg0: i32) -> (i32, i32) {
    %c0_i32 = arith.constant 0 : i32
    %c0_i32_0 = arith.constant 0 : i32
    %c0_i32_1 = arith.constant 0 : i32
    return %c0_i32, %c0_i32_0 : i32, i32
  }
  func.func @transform_4(%arg0: i32) -> (i32, i32) {
    %c0_i32 = arith.constant 0 : i32
    %c0_i32_0 = arith.constant 0 : i32
    %c0_i32_1 = arith.constant 0 : i32
    return %c0_i32, %c0_i32_0 : i32, i32
  }
  func.func @transform_5(%arg0: i32) -> (i32, i32) {
    %c0_i32 = arith.constant 0 : i32
    %c0_i32_0 = arith.constant 0 : i32
    return %arg0, %c0_i32 : i32, i32
  }
}

</mosaic_0001>

<bundles_post_ra>
// kernel: tpu_custom_call.1
= control target key start
LH: loop header
LB: loop body
LE: loop exit
PB: predicated region body
PF: predicated region fallthrough
CT: control target
= control target key end

     0   :  { %10 = vsyncpa [#allocation3], 0  ;;  %s1471_s0 = inlined_call_operand.hbm [shape: f32[16,512], index: 0, kind: input, shape index: {}]   ;;  %s1472_s1 = inlined_call_operand.hbm [shape: f32[512,256], index: 1, kind: input, shape index: {}]   ;;  %s1473_s2 = inlined_call_operand.vmem [shape: f32[1,256], index: 2, kind: input, shape index: {}]   ;;  %s1474_s3 = inlined_call_operand.hbm [shape: f32[256,512], index: 3, kind: input, shape index: {}]   ;;  %s1475_s4 = inlined_call_operand.vmem [shape: f32[1,512], index: 4, kind: input, shape index: {}]   ;;  %s1476_s5 = inlined_call_operand.hbm [shape: f32[16,512], index: 5, kind: output, shape index: {}]  }
   0x1   :  { %12 = vsyncpa [#allocation3 + $0x1], 0 }
   0x2   :  { %13 = vsyncpa [#allocation6], 0 }
   0x3   :  { %14 = vsyncpa [#allocation4], 0 }
   0x4   :  { %16 = vsyncpa [#allocation4 + $0x1], 0  ;;  %s1278_s18 = smov 0   ;;  %s1280_s19 = smov 0  }
   0x5   :  { %s1282_s20 = smov 0   ;;  %s1284_s21 = smov 0  }
   0x6 LB: > { %s1299_s22 = sadd.s32 4294967295, %s1238_s21   ;;  %s989_s23 = sadd.s32 4294967294, %s1238_s21   ;;  %s1238_s21 = sphi %s1284_s21, %s1498_s21   ;;  %s1234_s20 = sphi %s1282_s20, %s1497_s20   ;;  %s1230_s19 = sphi %s1280_s19, %s1496_s19   ;;  %s1226_s18 = sphi %s1278_s18, %s1495_s18  }
   0x7   : > { %p42_p0 = scmp.ne.s32.totalorder %s1230_s19, %s1226_s18  ;;  %p1477_p1 = scmp.eq.s32.totalorder %s1299_s22, 0 }
   0x8   : > { %p156_p3 = scmp.eq.s32.totalorder %s989_s23, 1  ;;  %p990_p5 = scmp.ge.s32.totalorder %s1238_s21, 1 }
   0x9   : > { %p1308_p4 = por %p1477_p1, %p42_p0  ;;  %p163_p7 = scmp.lt.s32.totalorder %s1238_s21, 3 }
   0xa   : > { %p1313_p6 = por %p156_p3, %p42_p0  ;;  %s1240_s27 = smov [#allocation5]  }
   0xb   : > { %s1481_s24 = scalar_select %p1308_p4, 1, 0 }
   0xc   : > { %s1482_s25 = scalar_select %p1313_p6, 1, 0 }
   0xd   : > { %p1318_p8 = pnand %p990_p5, %p163_p7  ;;  %s175_s28 = sshll.u32 %s1240_s27, 4  ;;  %s176_s28 = int_to_ptr.vmem [resolvable:$true] %s175_s28 }
   0xe   : > { %s1241_s30 = smov [#allocation7]   ;;  %s1101_s7 = scalar_lea.vmem %s176_s28, 16384 }
   0xf   : > { %s1483_s26 = scalar_select %p1318_p8, 1, 0 }
  0x10   : > { %p1021_p9 = pneg %p1318_p8  ;;  %s191_s6 = sshll.u32 %s1241_s30, 4  ;;  %s192_s6 = int_to_ptr.vmem [resolvable:$true] %s191_s6 }
  0x11   : > { %p1102_p13 = scmp.ne.s32.totalorder %s176_s28, %s1101_s7  ;;  %p1109_p5 = scmp.lt.s32.totalorder %s176_s28, %s176_s28 }
  0x12   : > { %p1327_p11 = pnand %p1021_p9, %p1477_p1  ;;  %p1110_p7 = scmp.lt.s32.totalorder %s1101_s7, %s1101_s7 }
  0x14   : > { %p1092_p12 = pneg %p1327_p11  ;;  %p1111_p10 = por %p1110_p7, %p1109_p5 }
  0x16   : > { %p1104_p0 = pnand %p1102_p13, %p1092_p12 }
  0x18   : > { %p1105_p3 = pneg %p1104_p0 }
  0x1a   : > { %p1112_p9 = pnand %p1111_p10, %p1105_p3 }
  0x1c   : > { %1115 = shalt.err (!%p1112_p9)
}
  0x1d   : > { %s1242_s8 = smov 256   ;;  %s1243_s9 = smov 16  }
  0x1e   : > { %1024 = dma.hbm_to_vmem [thread:$0]  (!%p1327_p11), %s1472_s1, 16384, %s176_s28, [#allocation6], %s1242_s8, %s1242_s8, %s1243_s9  }
  0x1f   : > { %s1127_s12 = scalar_lea.vmem %s192_s6, 16384  ;;  %p1135_p2 = scmp.lt.s32.totalorder %s192_s6, %s192_s6 }
  0x20   : > { %p1128_p1 = scmp.ne.s32.totalorder %s192_s6, %s1127_s12  ;;  %p1136_p6 = scmp.lt.s32.totalorder %s1127_s12, %s1127_s12 }
  0x22   : > { %p1130_p13 = pnand %p1128_p1, %p1092_p12  ;;  %p1137_p5 = por %p1136_p6, %p1135_p2 }
  0x24   : > { %p1131_p0 = pneg %p1130_p13 }
  0x26   : > { %p1138_p10 = pnand %p1137_p5, %p1131_p0 }
  0x28   : > { %1141 = shalt.err (!%p1138_p10)
}
  0x29   : > { %s1244_s13 = smov 512   ;;  %s1245_s14 = smov 32  }
  0x2a   : > { %1027 = dma.hbm_to_vmem [thread:$0]  (!%p1327_p11), %s1474_s3, 16384, %s192_s6, [#allocation6], %s1244_s13, %s1244_s13, %s1245_s14  }
  0x2b   : > { %s1350_s17 = sadd.s32 1, %s1238_s21   ;;  %s29_s27 = sadd.s32 1, %s1234_s20 }
  0x2c   : > { %s26_s23 = ssub.s32 %s1238_s21, %s1350_s17  ;;  %p36_p2 = scmp.ne.s32.totalorder %s1234_s20, %s1230_s19 }
  0x2d   : > { %p27_p1 = scmp.eq.s32.totalorder %s26_s23, 0  ;;  %p37_p6 = scmp.eq.s32.totalorder %s1238_s21, 0 }
  0x2e   : > { %p1485_p3 = scmp.eq.s32.totalorder %s1299_s22, 1  ;;  %p1038_p9 = scmp.lt.s32.totalorder %s1238_s21, 2 }
  0x2f   : > { %s1359_s28 = scalar_select %p27_p1, %s1234_s20, %s29_s27  }
  0x30   : > { %p38_p12 = por %p37_p6, %p36_p2  ;;  %p1363_p7 = por %p1485_p3, %p36_p2 }
  0x31   : > { %s208_s29 = sand.u32 1, %s1234_s20   ;;  %s1007_s6 = sshll.u32 %s1238_s21, 9 }
  0x32   : > { %s1486_s30 = scalar_select %p1363_p7, 1, 0 }
  0x33   : > { %s994_s7 = sshll.u32 %s208_s29, 5  ;;  %s1373_s10 = scalar_lea.hbm %s1471_s0, %s1007_s6 }
  0x34   : > { %s212_s11 = scalar_lea.vmem [#allocation2], %s994_s7  ;;  %p1375_p11 = pnand %p1038_p9, %p38_p12 }
  0x35   : > { %s220_s12 = sshll.u32 %s212_s11, 4  ;;  %s209_s14 = scalar_lea.sflag [#allocation3], %s208_s29  ;;  %s221_s12 = int_to_ptr.vmem [resolvable:$true] %s220_s12 }
  0x36   : > { %s1142_s15 = scalar_lea.hbm %s1373_s10, 512  ;;  %p1144_p0 = pneg %p1375_p11 }
  0x37   : > { %p1143_p13 = scmp.ne.s32.totalorder %s1373_s10, %s1142_s15  ;;  %s1147_s27 = scalar_lea.hbm %s1471_s0, 1024 }
  0x38   : > { %p1148_p1 = scmp.lt.s32.totalorder %s1373_s10, %s1471_s0  ;;  %p1149_p2 = scmp.lt.s32.totalorder %s1147_s27, %s1142_s15 }
  0x39   : > { %p1145_p5 = pnand %p1144_p0, %p1143_p13 }
  0x3a   : > { %p1150_p6 = por %p1149_p2, %p1148_p1 }
  0x3b   : > { %p1146_p10 = pneg %p1145_p5 }
  0x3d   : > { %p1151_p12 = pnand %p1150_p6, %p1146_p10 }
  0x3f   : > { %1154 = shalt.err (!%p1151_p12)
}
  0x40   : > { %s1155_s8 = scalar_lea.vmem %s221_s12, 512  ;;  %s1246_s29 = smov [#allocation2]  }
  0x41   : > { %p1156_p3 = scmp.ne.s32.totalorder %s221_s12, %s1155_s8  ;;  %s1160_s9 = sshll.u32 %s1246_s29, 4  ;;  %s1161_s9 = int_to_ptr.vmem [resolvable:$false] %s1160_s9 }
  0x42   : > { %s1162_s11 = scalar_lea.vmem %s1161_s9, 1024  ;;  %p1163_p13 = scmp.lt.s32.totalorder %s221_s12, %s1161_s9 }
  0x43   : > { %p1158_p9 = pnand %p1156_p3, %p1144_p0  ;;  %p1164_p5 = scmp.lt.s32.totalorder %s1162_s11, %s1155_s8 }
  0x45   : > { %p1159_p7 = pneg %p1158_p9  ;;  %p1165_p4 = por %p1164_p5, %p1163_p13 }
  0x47   : > { %p1166_p8 = pnand %p1165_p4, %p1159_p7 }
  0x49   : > { %1169 = shalt.err (!%p1166_p8)
}
  0x4a   : > { %1031 = dma.hbm_to_vmem [thread:$0]  (!%p1375_p11), %s1373_s10, 512, %s221_s12, %s209_s14  }
  0x4b   : > { %p1488_p10 = scmp.ne.s32.totalorder %s1483_s26, 0 }
  0x4c   : > { %s1396_s15 = sand.u32 (!%p1488_p10), 1, %s1230_s19   ;;  %p1489_p4 = scmp.ne.s32.totalorder (!%p1488_p10), %s1481_s24, 0 }
  0x4d   : > { %229 = sbr.rel (%p1488_p10) target bundleno = 888 (0x378), region = 40  ;;  %s998_s16 = sshll.u32 (!%p1488_p10), %s1396_s15, 5 }
  0x4e   : > { %s232_s23 = scalar_lea.sflag (!%p1488_p10), [#allocation3], %s1396_s15  ;;  %s1402_s27 = scalar_lea.vmem (!%p1488_p10), [#allocation2], %s998_s16 }
  0x52   : > { %1213 = dma.done.wait (%p1489_p4), %s232_s23, 512  }
  0x53   : > { %1215 = vsyncadd (%p1489_p4), %s232_s23, 4294966784  ;;  %p1490_p8 = scmp.eq.s32.totalorder %s1299_s22, 0 }
  0x55   : > { %1217 = dma.done.wait (%p1490_p8), [#allocation6], 32768   ;;  %p1491_p7 = pmov %p1490_p8 }
  0x56   : > { %v305_v0 = vld [vmem:[#allocation5 + $0xf8] sm:$0xff]  ;;  %v304_v2 = vld [vmem:[#allocation5 + $0xf0] sm:$0xff]  ;;  %v303_v4 = vld [vmem:[#allocation5 + $0xe8] sm:$0xff]  ;;  %s1008_s13 = sshll.u32 %s1299_s22, 9  ;;  %s269_s14 = scalar_lea.vmem [#allocation8], %s998_s16 }
  0x57   : > { %1219 = vsyncadd (%p1491_p7), [#allocation6], 4294934528  ;;  %v369_v1 = vld [vmem:[#allocation5 + $0x2f8] sm:$0xff]  ;;  %414 = vmatprep.subr.mxu0 %v305_v0  ;;  %v368_v3 = vld [vmem:[#allocation5 + $0x2f0] sm:$0xff]  ;;  %s900_s6 = sshll.u32 %s269_s14, 4  ;;  %s1428_s29 = scalar_lea.hbm %s1476_s5, %s1008_s13  ;;  %s1430_s6 = int_to_ptr.vmem [resolvable:$true] %s900_s6 }
  0x58   : > { %485 = vmatprep.subr.mxu1 %v369_v1  ;;  %v367_v5 = vld [vmem:[#allocation5 + $0x2e8] sm:$0xff]  ;;  %415 = vmatpush1.msra.mxu0 %v304_v2  ;;  %v302_v6 = vld [vmem:[#allocation5 + $0xe0] sm:$0xff]  ;;  %v301_v8 = vld [vmem:[#allocation5 + $0xd8] sm:$0xff]  ;;  %s886_s22 = scalar_lea.sflag [#allocation4], %s1396_s15  ;;  %s1170_s9 = scalar_lea.vmem %s1430_s6, 512 }
  0x59   : > { %486 = vmatpush1.msra.mxu1 %v368_v3  ;;  %v366_v7 = vld [vmem:[#allocation5 + $0x2e0] sm:$0xff]  ;;  %416 = vmatprep.subr.mxu0 %v303_v4  ;;  %v365_v9 = vld [vmem:[#allocation5 + $0x2d8] sm:$0xff]  ;;  %v300_v10 = vld [vmem:[#allocation5 + $0xd0] sm:$0xff]  ;;  %p1171_p11 = scmp.ne.s32.totalorder %s1430_s6, %s1170_s9  ;;  %p1492_p0 = scmp.ne.s32.totalorder %s1486_s30, 0 }
  0x5a   : > { %487 = vmatprep.subr.mxu1 %v367_v5  ;;  %v364_v11 = vld [vmem:[#allocation5 + $0x2d0] sm:$0xff]  ;;  %417 = vmatpush1.msra.mxu0 %v302_v6  ;;  %v299_v12 = vld [vmem:[#allocation5 + $0xc8] sm:$0xff]  ;;  %v298_v14 = vld [vmem:[#allocation5 + $0xc0] sm:$0xff]  ;;  %s1247_s11 = smov [#allocation8]  }
  0x5b   : > { %488 = vmatpush1.msra.mxu1 %v366_v7  ;;  %v363_v13 = vld [vmem:[#allocation5 + $0x2c8] sm:$0xff]  ;;  %418 = vmatprep.subr.mxu0 %v301_v8  ;;  %v362_v15 = vld [vmem:[#allocation5 + $0x2c0] sm:$0xff]  ;;  %v297_v16 = vld [vmem:[#allocation5 + $0xb8] sm:$0xff]  ;;  %p1172_p1 = pnand %p1171_p11, %p1492_p0  ;;  %s1174_s16 = sshll.u32 %s1247_s11, 4  ;;  %s1175_s16 = int_to_ptr.vmem [resolvable:$false] %s1174_s16 }
  0x5c   : > { %489 = vmatprep.subr.mxu1 %v365_v9  ;;  %419 = vmatpush1.msra.mxu0 %v300_v10  ;;  %v361_v17 = vld [vmem:[#allocation5 + $0x2b8] sm:$0xff]  ;;  %v296_v18 = vld [vmem:[#allocation5 + $0xb0] sm:$0xff]  ;;  %v295_v20 = vld [vmem:[#allocation5 + $0xa8] sm:$0xff]  ;;  %s1176_s23 = scalar_lea.vmem %s1175_s16, 1024  ;;  %p1177_p6 = scmp.lt.s32.totalorder %s1430_s6, %s1175_s16 }
  0x5d   : > { %490 = vmatpush1.msra.mxu1 %v364_v11  ;;  %420 = vmatprep.subr.mxu0 %v299_v12  ;;  %v360_v19 = vld [vmem:[#allocation5 + $0x2b0] sm:$0xff]  ;;  %v359_v21 = vld [vmem:[#allocation5 + $0x2a8] sm:$0xff]  ;;  %v294_v22 = vld [vmem:[#allocation5 + $0xa0] sm:$0xff]  ;;  %p1173_p2 = pneg %p1172_p1  ;;  %p1178_p12 = scmp.lt.s32.totalorder %s1176_s23, %s1170_s9 }
  0x5e   : > { %491 = vmatprep.subr.mxu1 %v363_v13  ;;  %421 = vmatpush1.msra.mxu0 %v298_v14  ;;  %v358_v23 = vld [vmem:[#allocation5 + $0x2a0] sm:$0xff]  ;;  %v293_v24 = vld [vmem:[#allocation5 + $0x98] sm:$0xff]  ;;  %v292_v26 = vld [vmem:[#allocation5 + $0x90] sm:$0xff] }
  0x5f   : > { %492 = vmatpush1.msra.mxu1 %v362_v15  ;;  %422 = vmatprep.subr.mxu0 %v297_v16  ;;  %v357_v25 = vld [vmem:[#allocation5 + $0x298] sm:$0xff]  ;;  %v356_v27 = vld [vmem:[#allocation5 + $0x290] sm:$0xff]  ;;  %v291_v28 = vld [vmem:[#allocation5 + $0x88] sm:$0xff]  ;;  %p1179_p3 = por %p1178_p12, %p1177_p6 }
  0x60   : > { %493 = vmatprep.subr.mxu1 %v361_v17  ;;  %423 = vmatpush1.msra.mxu0 %v296_v18  ;;  %v355_v29 = vld [vmem:[#allocation5 + $0x288] sm:$0xff]  ;;  %v290_v30 = vld [vmem:[#allocation5 + $0x80] sm:$0xff]  ;;  %v289_v32 = vld [vmem:[#allocation5 + $0x78] sm:$0xff] }
  0x61   : > { %494 = vmatpush1.msra.mxu1 %v360_v19  ;;  %424 = vmatprep.subr.mxu0 %v295_v20  ;;  %v354_v31 = vld [vmem:[#allocation5 + $0x280] sm:$0xff]  ;;  %v353_v33 = vld [vmem:[#allocation5 + $0x278] sm:$0xff]  ;;  %v288_v34 = vld [vmem:[#allocation5 + $0x70] sm:$0xff]  ;;  %p1180_p9 = pnand %p1179_p3, %p1173_p2 }
  0x62   : > { %495 = vmatprep.subr.mxu1 %v359_v21  ;;  %425 = vmatpush1.msra.mxu0 %v294_v22  ;;  %v352_v35 = vld [vmem:[#allocation5 + $0x270] sm:$0xff]  ;;  %v287_v36 = vld [vmem:[#allocation5 + $0x68] sm:$0xff]  ;;  %v286_v38 = vld [vmem:[#allocation5 + $0x60] sm:$0xff] }
  0x63   : > { %496 = vmatpush1.msra.mxu1 %v358_v23  ;;  %426 = vmatprep.subr.mxu0 %v293_v24  ;;  %v351_v37 = vld [vmem:[#allocation5 + $0x268] sm:$0xff]  ;;  %v350_v39 = vld [vmem:[#allocation5 + $0x260] sm:$0xff]  ;;  %v285_v40 = vld [vmem:[#allocation5 + $0x58] sm:$0xff] }
  0x64   : > { %497 = vmatprep.subr.mxu1 %v357_v25  ;;  %427 = vmatpush1.msra.mxu0 %v292_v26  ;;  %v349_v41 = vld [vmem:[#allocation5 + $0x258] sm:$0xff]  ;;  %v284_v42 = vld [vmem:[#allocation5 + $0x50] sm:$0xff]  ;;  %v283_v44 = vld [vmem:[#allocation5 + $0x48] sm:$0xff] }
  0x65   : > { %498 = vmatpush1.msra.mxu1 %v356_v27  ;;  %428 = vmatprep.subr.mxu0 %v291_v28  ;;  %v348_v43 = vld [vmem:[#allocation5 + $0x250] sm:$0xff]  ;;  %v347_v45 = vld [vmem:[#allocation5 + $0x248] sm:$0xff]  ;;  %v282_v46 = vld [vmem:[#allocation5 + $0x40] sm:$0xff] }
  0x66   : > { %499 = vmatprep.subr.mxu1 %v355_v29  ;;  %429 = vmatpush1.msra.mxu0 %v290_v30  ;;  %v346_v47 = vld [vmem:[#allocation5 + $0x240] sm:$0xff]  ;;  %v281_v48 = vld [vmem:[#allocation5 + $0x38] sm:$0xff]  ;;  %v280_v50 = vld [vmem:[#allocation5 + $0x30] sm:$0xff] }
  0x67   : > { %500 = vmatpush1.msra.mxu1 %v354_v31  ;;  %430 = vmatprep.subr.mxu0 %v289_v32  ;;  %v345_v49 = vld [vmem:[#allocation5 + $0x238] sm:$0xff]  ;;  %v344_v51 = vld [vmem:[#allocation5 + $0x230] sm:$0xff]  ;;  %v279_v52 = vld [vmem:[#allocation5 + $0x28] sm:$0xff] }
  0x68   : > { %501 = vmatprep.subr.mxu1 %v353_v33  ;;  %431 = vmatpush1.msra.mxu0 %v288_v34  ;;  %v343_v53 = vld [vmem:[#allocation5 + $0x228] sm:$0xff]  ;;  %v278_v54 = vld [vmem:[#allocation5 + $0x20] sm:$0xff]  ;;  %v277_v56 = vld [vmem:[#allocation5 + $0x18] sm:$0xff] }
  0x69   : > { %502 = vmatpush1.msra.mxu1 %v352_v35  ;;  %432 = vmatprep.subr.mxu0 %v287_v36  ;;  %v342_v55 = vld [vmem:[#allocation5 + $0x220] sm:$0xff]  ;;  %v341_v57 = vld [vmem:[#allocation5 + $0x218] sm:$0xff]  ;;  %v276_v58 = vld [vmem:[#allocation5 + $0x10] sm:$0xff] }
  0x6a   : > { %503 = vmatprep.subr.mxu1 %v351_v37  ;;  %433 = vmatpush1.msra.mxu0 %v286_v38  ;;  %v340_v59 = vld [vmem:[#allocation5 + $0x210] sm:$0xff]  ;;  %v275_v60 = vld [vmem:[#allocation5 + $0x8] sm:$0xff]  ;;  %v274_v62 = vld [vmem:[#allocation5] sm:$0xff] }
  0x6b   : > { %504 = vmatpush1.msra.mxu1 %v350_v39  ;;  %434 = vmatprep.subr.mxu0 %v285_v40  ;;  %v339_v61 = vld [vmem:[#allocation5 + $0x208] sm:$0xff]  ;;  %v338_v63 = vld [vmem:[#allocation5 + $0x200] sm:$0xff]  ;;  %v337_v0 = vld [vmem:[#allocation5 + $0x1f8] sm:$0xff] }
  0x6c   : > { %505 = vmatprep.subr.mxu1 %v349_v41  ;;  %435 = vmatpush1.msra.mxu0 %v284_v42  ;;  %v401_v1 = vld [vmem:[#allocation5 + $0x3f8] sm:$0xff]  ;;  %v336_v2 = vld [vmem:[#allocation5 + $0x1f0] sm:$0xff]  ;;  %v335_v4 = vld [vmem:[#allocation5 + $0x1e8] sm:$0xff] }
  0x6d   : > { %506 = vmatpush1.msra.mxu1 %v348_v43  ;;  %436 = vmatprep.subr.mxu0 %v283_v44  ;;  %v400_v3 = vld [vmem:[#allocation5 + $0x3f0] sm:$0xff]  ;;  %v399_v5 = vld [vmem:[#allocation5 + $0x3e8] sm:$0xff]  ;;  %v334_v6 = vld [vmem:[#allocation5 + $0x1e0] sm:$0xff] }
  0x6e   : > { %507 = vmatprep.subr.mxu1 %v347_v45  ;;  %437 = vmatpush1.msra.mxu0 %v282_v46  ;;  %v398_v7 = vld [vmem:[#allocation5 + $0x3e0] sm:$0xff]  ;;  %v333_v8 = vld [vmem:[#allocation5 + $0x1d8] sm:$0xff]  ;;  %v332_v10 = vld [vmem:[#allocation5 + $0x1d0] sm:$0xff] }
  0x6f   : > { %508 = vmatpush1.msra.mxu1 %v346_v47  ;;  %438 = vmatprep.subr.mxu0 %v281_v48  ;;  %v397_v9 = vld [vmem:[#allocation5 + $0x3d8] sm:$0xff]  ;;  %v396_v11 = vld [vmem:[#allocation5 + $0x3d0] sm:$0xff]  ;;  %v331_v12 = vld [vmem:[#allocation5 + $0x1c8] sm:$0xff] }
  0x70   : > { %509 = vmatprep.subr.mxu1 %v345_v49  ;;  %439 = vmatpush1.msra.mxu0 %v280_v50  ;;  %v395_v13 = vld [vmem:[#allocation5 + $0x3c8] sm:$0xff]  ;;  %v330_v14 = vld [vmem:[#allocation5 + $0x1c0] sm:$0xff]  ;;  %v329_v16 = vld [vmem:[#allocation5 + $0x1b8] sm:$0xff] }
  0x71   : > { %510 = vmatpush1.msra.mxu1 %v344_v51  ;;  %440 = vmatprep.subr.mxu0 %v279_v52  ;;  %v394_v15 = vld [vmem:[#allocation5 + $0x3c0] sm:$0xff]  ;;  %v393_v17 = vld [vmem:[#allocation5 + $0x3b8] sm:$0xff]  ;;  %v328_v18 = vld [vmem:[#allocation5 + $0x1b0] sm:$0xff] }
  0x72   : > { %511 = vmatprep.subr.mxu1 %v343_v53  ;;  %441 = vmatpush1.msra.mxu0 %v278_v54  ;;  %v392_v19 = vld [vmem:[#allocation5 + $0x3b0] sm:$0xff]  ;;  %v327_v20 = vld [vmem:[#allocation5 + $0x1a8] sm:$0xff]  ;;  %v326_v22 = vld [vmem:[#allocation5 + $0x1a0] sm:$0xff] }
  0x73   : > { %512 = vmatpush1.msra.mxu1 %v342_v55  ;;  %442 = vmatprep.subr.mxu0 %v277_v56  ;;  %v391_v21 = vld [vmem:[#allocation5 + $0x3a8] sm:$0xff]  ;;  %v390_v23 = vld [vmem:[#allocation5 + $0x3a0] sm:$0xff]  ;;  %v325_v24 = vld [vmem:[#allocation5 + $0x198] sm:$0xff] }
  0x74   : > { %513 = vmatprep.subr.mxu1 %v341_v57  ;;  %443 = vmatpush1.msra.mxu0 %v276_v58  ;;  %v389_v25 = vld [vmem:[#allocation5 + $0x398] sm:$0xff]  ;;  %v324_v26 = vld [vmem:[#allocation5 + $0x190] sm:$0xff]  ;;  %v323_v28 = vld [vmem:[#allocation5 + $0x188] sm:$0xff] }
  0x75   : > { %514 = vmatpush1.msra.mxu1 %v340_v59  ;;  %444 = vmatprep.subr.mxu0 %v275_v60  ;;  %v388_v27 = vld [vmem:[#allocation5 + $0x390] sm:$0xff]  ;;  %v387_v29 = vld [vmem:[#allocation5 + $0x388] sm:$0xff]  ;;  %v322_v30 = vld [vmem:[#allocation5 + $0x180] sm:$0xff] }
  0x76   : > { %515 = vmatprep.subr.mxu1 %v339_v61  ;;  %445 = vmatpush1.msra.mxu0 %v274_v62  ;;  %v386_v31 = vld [vmem:[#allocation5 + $0x380] sm:$0xff]  ;;  %v321_v32 = vld [vmem:[#allocation5 + $0x178] sm:$0xff]  ;;  %v320_v34 = vld [vmem:[#allocation5 + $0x170] sm:$0xff] }
  0x77   : > { %516 = vmatpush1.msra.mxu1 %v338_v63  ;;  %446 = vmatprep.subr.mxu0 %v337_v0  ;;  %v385_v33 = vld [vmem:[#allocation5 + $0x378] sm:$0xff]  ;;  %v384_v35 = vld [vmem:[#allocation5 + $0x370] sm:$0xff]  ;;  %v319_v36 = vld [vmem:[#allocation5 + $0x168] sm:$0xff] }
  0x78   : > { %517 = vmatprep.subr.mxu1 %v401_v1  ;;  %447 = vmatpush2.msra.mxu0 %v336_v2  ;;  %v383_v37 = vld [vmem:[#allocation5 + $0x368] sm:$0xff]  ;;  %v318_v38 = vld [vmem:[#allocation5 + $0x160] sm:$0xff]  ;;  %v317_v40 = vld [vmem:[#allocation5 + $0x158] sm:$0xff] }
  0x79   : > { %518 = vmatpush2.msra.mxu1 %v400_v3  ;;  %448 = vmatprep.subr.mxu0 %v335_v4  ;;  %v382_v39 = vld [vmem:[#allocation5 + $0x360] sm:$0xff]  ;;  %v381_v41 = vld [vmem:[#allocation5 + $0x358] sm:$0xff]  ;;  %v316_v42 = vld [vmem:[#allocation5 + $0x150] sm:$0xff] }
  0x7a   : > { %519 = vmatprep.subr.mxu1 %v399_v5  ;;  %449 = vmatpush2.msra.mxu0 %v334_v6  ;;  %v380_v43 = vld [vmem:[#allocation5 + $0x350] sm:$0xff]  ;;  %v315_v44 = vld [vmem:[#allocation5 + $0x148] sm:$0xff]  ;;  %v314_v46 = vld [vmem:[#allocation5 + $0x140] sm:$0xff] }
  0x7b   : > { %520 = vmatpush2.msra.mxu1 %v398_v7  ;;  %450 = vmatprep.subr.mxu0 %v333_v8  ;;  %v379_v45 = vld [vmem:[#allocation5 + $0x348] sm:$0xff]  ;;  %v378_v47 = vld [vmem:[#allocation5 + $0x340] sm:$0xff]  ;;  %v313_v48 = vld [vmem:[#allocation5 + $0x138] sm:$0xff] }
  0x7c   : > { %521 = vmatprep.subr.mxu1 %v397_v9  ;;  %451 = vmatpush2.msra.mxu0 %v332_v10  ;;  %v377_v49 = vld [vmem:[#allocation5 + $0x338] sm:$0xff]  ;;  %v312_v50 = vld [vmem:[#allocation5 + $0x130] sm:$0xff]  ;;  %v311_v52 = vld [vmem:[#allocation5 + $0x128] sm:$0xff] }
  0x7d   : > { %522 = vmatpush2.msra.mxu1 %v396_v11  ;;  %452 = vmatprep.subr.mxu0 %v331_v12  ;;  %v376_v51 = vld [vmem:[#allocation5 + $0x330] sm:$0xff]  ;;  %v375_v53 = vld [vmem:[#allocation5 + $0x328] sm:$0xff]  ;;  %v310_v54 = vld [vmem:[#allocation5 + $0x120] sm:$0xff] }
  0x7e   : > { %523 = vmatprep.subr.mxu1 %v395_v13  ;;  %453 = vmatpush2.msra.mxu0 %v330_v14  ;;  %v374_v55 = vld [vmem:[#allocation5 + $0x320] sm:$0xff]  ;;  %v309_v56 = vld [vmem:[#allocation5 + $0x118] sm:$0xff]  ;;  %v308_v58 = vld [vmem:[#allocation5 + $0x110] sm:$0xff] }
  0x7f   : > { %524 = vmatpush2.msra.mxu1 %v394_v15  ;;  %454 = vmatprep.subr.mxu0 %v329_v16  ;;  %v373_v57 = vld [vmem:[#allocation5 + $0x318] sm:$0xff]  ;;  %v372_v59 = vld [vmem:[#allocation5 + $0x310] sm:$0xff]  ;;  %v307_v60 = vld [vmem:[#allocation5 + $0x108] sm:$0xff] }
  0x80   : > { %525 = vmatprep.subr.mxu1 %v393_v17  ;;  %455 = vmatpush2.msra.mxu0 %v328_v18  ;;  %v371_v61 = vld [vmem:[#allocation5 + $0x308] sm:$0xff]  ;;  %v306_v62 = vld [vmem:[#allocation5 + $0x100] sm:$0xff]  ;;  %v273_v1 = vld [vmem:[%s1402_s27 + $0x18] sm:$0xff] }
  0x81   : > { %526 = vmatpush2.msra.mxu1 %v392_v19  ;;  %456 = vmatprep.subr.mxu0 %v327_v20  ;;  %v271_v63 = vld [vmem:[%s1402_s27 + $0x8] sm:$0xff]  ;;  %v370_v0 = vld [vmem:[#allocation5 + $0x300] sm:$0xff]  ;;  %v272_v3 = vld [vmem:[%s1402_s27 + $0x10] sm:$0xff] }
  0x82   : > { %527 = vmatprep.subr.mxu1 %v391_v21  ;;  %457 = vmatpush2.msra.mxu0 %v326_v22  ;;  %v270_v2 = vld [vmem:[%s1402_s27] sm:$0xff]  ;;  %v619_v4 = vld [vmem:[#allocation7 + $0x1e8] sm:$0xff]  ;;  %v621_v5 = vld [vmem:[#allocation7 + $0x1f8] sm:$0xff] }
  0x83   : > { %528 = vmatpush2.msra.mxu1 %v390_v23  ;;  %458 = vmatprep.subr.mxu0 %v325_v24  ;;  %v618_v6 = vld [vmem:[#allocation7 + $0x1e0] sm:$0xff]  ;;  %v620_v7 = vld [vmem:[#allocation7 + $0x1f0] sm:$0xff]  ;;  %v615_v8 = vld [vmem:[#allocation7 + $0x1c8] sm:$0xff] }
  0x84   : > { %529 = vmatprep.subr.mxu1 %v389_v25  ;;  %459 = vmatpush2.msra.mxu0 %v324_v26  ;;  %v617_v9 = vld [vmem:[#allocation7 + $0x1d8] sm:$0xff]  ;;  %v614_v10 = vld [vmem:[#allocation7 + $0x1c0] sm:$0xff]  ;;  %v616_v11 = vld [vmem:[#allocation7 + $0x1d0] sm:$0xff] }
  0x85   : > { %530 = vmatpush2.msra.mxu1 %v388_v27  ;;  %460 = vmatprep.subr.mxu0 %v323_v28  ;;  %v611_v12 = vld [vmem:[#allocation7 + $0x1a8] sm:$0xff]  ;;  %v613_v13 = vld [vmem:[#allocation7 + $0x1b8] sm:$0xff]  ;;  %v610_v14 = vld [vmem:[#allocation7 + $0x1a0] sm:$0xff] }
  0x86   : > { %531 = vmatprep.subr.mxu1 %v387_v29  ;;  %461 = vmatpush2.msra.mxu0 %v322_v30  ;;  %v612_v15 = vld [vmem:[#allocation7 + $0x1b0] sm:$0xff]  ;;  %v607_v16 = vld [vmem:[#allocation7 + $0x188] sm:$0xff]  ;;  %v609_v17 = vld [vmem:[#allocation7 + $0x198] sm:$0xff] }
  0x87   : > { %532 = vmatpush2.msra.mxu1 %v386_v31  ;;  %462 = vmatprep.subr.mxu0 %v321_v32  ;;  %v606_v18 = vld [vmem:[#allocation7 + $0x180] sm:$0xff]  ;;  %v608_v19 = vld [vmem:[#allocation7 + $0x190] sm:$0xff]  ;;  %v603_v20 = vld [vmem:[#allocation7 + $0x168] sm:$0xff] }
  0x88   : > { %533 = vmatprep.subr.mxu1 %v385_v33  ;;  %463 = vmatpush2.msra.mxu0 %v320_v34  ;;  %v605_v21 = vld [vmem:[#allocation7 + $0x178] sm:$0xff]  ;;  %v602_v22 = vld [vmem:[#allocation7 + $0x160] sm:$0xff]  ;;  %v604_v23 = vld [vmem:[#allocation7 + $0x170] sm:$0xff] }
  0x89   : > { %534 = vmatpush2.msra.mxu1 %v384_v35  ;;  %464 = vmatprep.subr.mxu0 %v319_v36  ;;  %v599_v24 = vld [vmem:[#allocation7 + $0x148] sm:$0xff]  ;;  %v601_v25 = vld [vmem:[#allocation7 + $0x158] sm:$0xff]  ;;  %v598_v26 = vld [vmem:[#allocation7 + $0x140] sm:$0xff] }
  0x8a   : > { %535 = vmatprep.subr.mxu1 %v383_v37  ;;  %465 = vmatpush2.msra.mxu0 %v318_v38  ;;  %v600_v27 = vld [vmem:[#allocation7 + $0x150] sm:$0xff]  ;;  %v595_v28 = vld [vmem:[#allocation7 + $0x128] sm:$0xff]  ;;  %v597_v29 = vld [vmem:[#allocation7 + $0x138] sm:$0xff] }
  0x8b   : > { %536 = vmatpush2.msra.mxu1 %v382_v39  ;;  %466 = vmatprep.subr.mxu0 %v317_v40  ;;  %v594_v30 = vld [vmem:[#allocation7 + $0x120] sm:$0xff]  ;;  %v596_v31 = vld [vmem:[#allocation7 + $0x130] sm:$0xff]  ;;  %v591_v32 = vld [vmem:[#allocation7 + $0x108] sm:$0xff] }
  0x8c   : > { %537 = vmatprep.subr.mxu1 %v381_v41  ;;  %467 = vmatpush2.msra.mxu0 %v316_v42  ;;  %v593_v33 = vld [vmem:[#allocation7 + $0x118] sm:$0xff]  ;;  %v590_v34 = vld [vmem:[#allocation7 + $0x100] sm:$0xff]  ;;  %v592_v35 = vld [vmem:[#allocation7 + $0x110] sm:$0xff] }
  0x8d   : > { %538 = vmatpush2.msra.mxu1 %v380_v43  ;;  %468 = vmatprep.subr.mxu0 %v315_v44  ;;  %v587_v36 = vld [vmem:[#allocation7 + $0xe8] sm:$0xff]  ;;  %v589_v37 = vld [vmem:[#allocation7 + $0xf8] sm:$0xff]  ;;  %v586_v38 = vld [vmem:[#allocation7 + $0xe0] sm:$0xff] }
  0x8e   : > { %539 = vmatprep.subr.mxu1 %v379_v45  ;;  %469 = vmatpush2.msra.mxu0 %v314_v46  ;;  %v588_v39 = vld [vmem:[#allocation7 + $0xf0] sm:$0xff]  ;;  %v583_v40 = vld [vmem:[#allocation7 + $0xc8] sm:$0xff]  ;;  %v585_v41 = vld [vmem:[#allocation7 + $0xd8] sm:$0xff] }
  0x8f   : > { %540 = vmatpush2.msra.mxu1 %v378_v47  ;;  %470 = vmatprep.subr.mxu0 %v313_v48  ;;  %v582_v42 = vld [vmem:[#allocation7 + $0xc0] sm:$0xff]  ;;  %v584_v43 = vld [vmem:[#allocation7 + $0xd0] sm:$0xff]  ;;  %v579_v44 = vld [vmem:[#allocation7 + $0xa8] sm:$0xff] }
  0x90   : > { %541 = vmatprep.subr.mxu1 %v377_v49  ;;  %471 = vmatpush2.msra.mxu0 %v312_v50  ;;  %v581_v45 = vld [vmem:[#allocation7 + $0xb8] sm:$0xff]  ;;  %v578_v46 = vld [vmem:[#allocation7 + $0xa0] sm:$0xff]  ;;  %v580_v47 = vld [vmem:[#allocation7 + $0xb0] sm:$0xff] }
  0x91   : > { %542 = vmatpush2.msra.mxu1 %v376_v51  ;;  %472 = vmatprep.subr.mxu0 %v311_v52  ;;  %v575_v48 = vld [vmem:[#allocation7 + $0x88] sm:$0xff]  ;;  %v577_v49 = vld [vmem:[#allocation7 + $0x98] sm:$0xff]  ;;  %v574_v50 = vld [vmem:[#allocation7 + $0x80] sm:$0xff] }
  0x92   : > { %543 = vmatprep.subr.mxu1 %v375_v53  ;;  %473 = vmatpush2.msra.mxu0 %v310_v54  ;;  %v576_v51 = vld [vmem:[#allocation7 + $0x90] sm:$0xff]  ;;  %v571_v52 = vld [vmem:[#allocation7 + $0x68] sm:$0xff]  ;;  %v573_v53 = vld [vmem:[#allocation7 + $0x78] sm:$0xff] }
  0x93   : > { %544 = vmatpush2.msra.mxu1 %v374_v55  ;;  %474 = vmatprep.subr.mxu0 %v309_v56  ;;  %v570_v54 = vld [vmem:[#allocation7 + $0x60] sm:$0xff]  ;;  %v572_v55 = vld [vmem:[#allocation7 + $0x70] sm:$0xff]  ;;  %v567_v56 = vld [vmem:[#allocation7 + $0x48] sm:$0xff] }
  0x94   : > { %545 = vmatprep.subr.mxu1 %v373_v57  ;;  %475 = vmatpush2.msra.mxu0 %v308_v58  ;;  %v569_v57 = vld [vmem:[#allocation7 + $0x58] sm:$0xff]  ;;  %v566_v58 = vld [vmem:[#allocation7 + $0x40] sm:$0xff] }
  0x95   : > { %546 = vmatpush2.msra.mxu1 %v372_v59  ;;  %476 = vmatprep.subr.mxu0 %v307_v60  ;;  %v568_v59 = vld [vmem:[#allocation7 + $0x50] sm:$0xff]  ;;  %v563_v60 = vld [vmem:[#allocation7 + $0x28] sm:$0xff] }
  0x96   : > { %547 = vmatprep.subr.mxu1 %v371_v61  ;;  %477 = vmatpush2.msra.mxu0 %v306_v62  ;;  %v565_v61 = vld [vmem:[#allocation7 + $0x38] sm:$0xff]  ;;  %v562_v62 = vld [vmem:[#allocation7 + $0x20] sm:$0xff] }
  0x97   : > { %478 = vmatprep.mubr.f32.mxu0 %v271_v63  ;;  %548 = vmatpush2.msra.mxu1 %v370_v0  ;;  %v564_v63 = vld [vmem:[#allocation7 + $0x30] sm:$0xff]  ;;  %v559_v0 = vld [vmem:[#allocation7 + $0x8] sm:$0xff] }
  0x98   : > { %549 = vmatprep.mubr.f32.mxu1 %v273_v1  ;;  %479 = vmatmul.mubr.f32.vlgmr.msra.gmra.mxu0 %v270_v2  ;;  %v561_v1 = vld [vmem:[#allocation7 + $0x18] sm:$0xff]  ;;  %v558_v2 = vld [vmem:[#allocation7] sm:$0xff] }
  0x99   : > { %550 = vmatmul.mubr.f32.vlgmr.msra.gmra.mxu1 %v272_v3  ;;  %708 = vmatprep.subr.mxu0 %v619_v4  ;;  %v560_v3 = vld [vmem:[#allocation7 + $0x10] sm:$0xff]  ;;  %v683_v4 = vld [vmem:[#allocation7 + $0x3e8] sm:$0xff] }
  0x9a   : > { %779 = vmatprep.subr.mxu1 %v621_v5  ;;  %709 = vmatpush1.msra.mxu0 %v618_v6  ;;  %v685_v5 = vld [vmem:[#allocation7 + $0x3f8] sm:$0xff]  ;;  %v682_v6 = vld [vmem:[#allocation7 + $0x3e0] sm:$0xff] }
  0x9b   : > { %780 = vmatpush1.msra.mxu1 %v620_v7  ;;  %710 = vmatprep.subr.mxu0 %v615_v8  ;;  %v684_v7 = vld [vmem:[#allocation7 + $0x3f0] sm:$0xff]  ;;  %v679_v8 = vld [vmem:[#allocation7 + $0x3c8] sm:$0xff] }
  0x9c   : > { %781 = vmatprep.subr.mxu1 %v617_v9  ;;  %711 = vmatpush1.msra.mxu0 %v614_v10  ;;  %v681_v9 = vld [vmem:[#allocation7 + $0x3d8] sm:$0xff]  ;;  %v678_v10 = vld [vmem:[#allocation7 + $0x3c0] sm:$0xff] }
  0x9d   : > { %782 = vmatpush1.msra.mxu1 %v616_v11  ;;  %712 = vmatprep.subr.mxu0 %v611_v12  ;;  %v680_v11 = vld [vmem:[#allocation7 + $0x3d0] sm:$0xff]  ;;  %v675_v12 = vld [vmem:[#allocation7 + $0x3a8] sm:$0xff] }
  0x9e   : > { %783 = vmatprep.subr.mxu1 %v613_v13  ;;  %713 = vmatpush1.msra.mxu0 %v610_v14  ;;  %v677_v13 = vld [vmem:[#allocation7 + $0x3b8] sm:$0xff]  ;;  %v674_v14 = vld [vmem:[#allocation7 + $0x3a0] sm:$0xff] }
  0x9f   : > { %784 = vmatpush1.msra.mxu1 %v612_v15  ;;  %714 = vmatprep.subr.mxu0 %v607_v16  ;;  %v676_v15 = vld [vmem:[#allocation7 + $0x3b0] sm:$0xff]  ;;  %v671_v16 = vld [vmem:[#allocation7 + $0x388] sm:$0xff] }
  0xa0   : > { %785 = vmatprep.subr.mxu1 %v609_v17  ;;  %715 = vmatpush1.msra.mxu0 %v606_v18  ;;  %v673_v17 = vld [vmem:[#allocation7 + $0x398] sm:$0xff]  ;;  %v670_v18 = vld [vmem:[#allocation7 + $0x380] sm:$0xff] }
  0xa1   : > { %786 = vmatpush1.msra.mxu1 %v608_v19  ;;  %716 = vmatprep.subr.mxu0 %v603_v20  ;;  %v672_v19 = vld [vmem:[#allocation7 + $0x390] sm:$0xff]  ;;  %v667_v20 = vld [vmem:[#allocation7 + $0x368] sm:$0xff] }
  0xa2   : > { %787 = vmatprep.subr.mxu1 %v605_v21  ;;  %717 = vmatpush1.msra.mxu0 %v602_v22  ;;  %v669_v21 = vld [vmem:[#allocation7 + $0x378] sm:$0xff]  ;;  %v666_v22 = vld [vmem:[#allocation7 + $0x360] sm:$0xff] }
  0xa3   : > { %788 = vmatpush1.msra.mxu1 %v604_v23  ;;  %718 = vmatprep.subr.mxu0 %v599_v24  ;;  %v668_v23 = vld [vmem:[#allocation7 + $0x370] sm:$0xff]  ;;  %v663_v24 = vld [vmem:[#allocation7 + $0x348] sm:$0xff] }
  0xa4   : > { %789 = vmatprep.subr.mxu1 %v601_v25  ;;  %719 = vmatpush1.msra.mxu0 %v598_v26  ;;  %v665_v25 = vld [vmem:[#allocation7 + $0x358] sm:$0xff]  ;;  %v662_v26 = vld [vmem:[#allocation7 + $0x340] sm:$0xff] }
  0xa5   : > { %790 = vmatpush1.msra.mxu1 %v600_v27  ;;  %720 = vmatprep.subr.mxu0 %v595_v28  ;;  %v664_v27 = vld [vmem:[#allocation7 + $0x350] sm:$0xff]  ;;  %v659_v28 = vld [vmem:[#allocation7 + $0x328] sm:$0xff] }
  0xa6   : > { %791 = vmatprep.subr.mxu1 %v597_v29  ;;  %721 = vmatpush1.msra.mxu0 %v594_v30  ;;  %v661_v29 = vld [vmem:[#allocation7 + $0x338] sm:$0xff]  ;;  %v658_v30 = vld [vmem:[#allocation7 + $0x320] sm:$0xff] }
  0xa7   : > { %792 = vmatpush1.msra.mxu1 %v596_v31  ;;  %722 = vmatprep.subr.mxu0 %v591_v32  ;;  %v660_v31 = vld [vmem:[#allocation7 + $0x330] sm:$0xff]  ;;  %v655_v32 = vld [vmem:[#allocation7 + $0x308] sm:$0xff] }
  0xa8   : > { %793 = vmatprep.subr.mxu1 %v593_v33  ;;  %723 = vmatpush1.msra.mxu0 %v590_v34  ;;  %v657_v33 = vld [vmem:[#allocation7 + $0x318] sm:$0xff]  ;;  %v654_v34 = vld [vmem:[#allocation7 + $0x300] sm:$0xff] }
  0xa9   : > { %794 = vmatpush1.msra.mxu1 %v592_v35  ;;  %724 = vmatprep.subr.mxu0 %v587_v36  ;;  %v656_v35 = vld [vmem:[#allocation7 + $0x310] sm:$0xff]  ;;  %v651_v36 = vld [vmem:[#allocation7 + $0x2e8] sm:$0xff] }
  0xaa   : > { %795 = vmatprep.subr.mxu1 %v589_v37  ;;  %725 = vmatpush1.msra.mxu0 %v586_v38  ;;  %v653_v37 = vld [vmem:[#allocation7 + $0x2f8] sm:$0xff]  ;;  %v650_v38 = vld [vmem:[#allocation7 + $0x2e0] sm:$0xff] }
  0xab   : > { %796 = vmatpush1.msra.mxu1 %v588_v39  ;;  %726 = vmatprep.subr.mxu0 %v583_v40  ;;  %v652_v39 = vld [vmem:[#allocation7 + $0x2f0] sm:$0xff]  ;;  %v647_v40 = vld [vmem:[#allocation7 + $0x2c8] sm:$0xff] }
  0xac   : > { %797 = vmatprep.subr.mxu1 %v585_v41  ;;  %727 = vmatpush1.msra.mxu0 %v582_v42  ;;  %v649_v41 = vld [vmem:[#allocation7 + $0x2d8] sm:$0xff]  ;;  %v646_v42 = vld [vmem:[#allocation7 + $0x2c0] sm:$0xff] }
  0xad   : > { %798 = vmatpush1.msra.mxu1 %v584_v43  ;;  %728 = vmatprep.subr.mxu0 %v579_v44  ;;  %v648_v43 = vld [vmem:[#allocation7 + $0x2d0] sm:$0xff]  ;;  %v643_v44 = vld [vmem:[#allocation7 + $0x2a8] sm:$0xff] }
  0xae   : > { %799 = vmatprep.subr.mxu1 %v581_v45  ;;  %729 = vmatpush1.msra.mxu0 %v578_v46  ;;  %v645_v45 = vld [vmem:[#allocation7 + $0x2b8] sm:$0xff]  ;;  %v642_v46 = vld [vmem:[#allocation7 + $0x2a0] sm:$0xff] }
  0xaf   : > { %800 = vmatpush1.msra.mxu1 %v580_v47  ;;  %730 = vmatprep.subr.mxu0 %v575_v48  ;;  %v644_v47 = vld [vmem:[#allocation7 + $0x2b0] sm:$0xff]  ;;  %v639_v48 = vld [vmem:[#allocation7 + $0x288] sm:$0xff] }
  0xb0   : > { %801 = vmatprep.subr.mxu1 %v577_v49  ;;  %731 = vmatpush1.msra.mxu0 %v574_v50  ;;  %v641_v49 = vld [vmem:[#allocation7 + $0x298] sm:$0xff]  ;;  %v638_v50 = vld [vmem:[#allocation7 + $0x280] sm:$0xff] }
  0xb1   : > { %802 = vmatpush1.msra.mxu1 %v576_v51  ;;  %732 = vmatprep.subr.mxu0 %v571_v52  ;;  %v640_v51 = vld [vmem:[#allocation7 + $0x290] sm:$0xff]  ;;  %v635_v52 = vld [vmem:[#allocation7 + $0x268] sm:$0xff] }
  0xb2   : > { %803 = vmatprep.subr.mxu1 %v573_v53  ;;  %733 = vmatpush1.msra.mxu0 %v570_v54  ;;  %v637_v53 = vld [vmem:[#allocation7 + $0x278] sm:$0xff]  ;;  %v634_v54 = vld [vmem:[#allocation7 + $0x260] sm:$0xff] }
  0xb3   : > { %804 = vmatpush1.msra.mxu1 %v572_v55  ;;  %734 = vmatprep.subr.mxu0 %v567_v56  ;;  %v636_v55 = vld [vmem:[#allocation7 + $0x270] sm:$0xff]  ;;  %v631_v56 = vld [vmem:[#allocation7 + $0x248] sm:$0xff] }
  0xb4   : > { %805 = vmatprep.subr.mxu1 %v569_v57  ;;  %735 = vmatpush1.msra.mxu0 %v566_v58  ;;  %v633_v57 = vld [vmem:[#allocation7 + $0x258] sm:$0xff]  ;;  %v630_v58 = vld [vmem:[#allocation7 + $0x240] sm:$0xff] }
  0xb5   : > { %806 = vmatpush1.msra.mxu1 %v568_v59  ;;  %736 = vmatprep.subr.mxu0 %v563_v60  ;;  %v632_v59 = vld [vmem:[#allocation7 + $0x250] sm:$0xff]  ;;  %v627_v60 = vld [vmem:[#allocation7 + $0x228] sm:$0xff] }
  0xb6   : > { %807 = vmatprep.subr.mxu1 %v565_v61  ;;  %737 = vmatpush1.msra.mxu0 %v562_v62  ;;  %v629_v61 = vld [vmem:[#allocation7 + $0x238] sm:$0xff]  ;;  %v626_v62 = vld [vmem:[#allocation7 + $0x220] sm:$0xff] }
  0xb7   : > { %808 = vmatpush1.msra.mxu1 %v564_v63  ;;  %738 = vmatprep.subr.mxu0 %v559_v0  ;;  %v628_v63 = vld [vmem:[#allocation7 + $0x230] sm:$0xff]  ;;  %v623_v0 = vld [vmem:[#allocation7 + $0x208] sm:$0xff] }
  0xb8   : > { %809 = vmatprep.subr.mxu1 %v561_v1  ;;  %739 = vmatpush1.msra.mxu0 %v558_v2  ;;  %v625_v1 = vld [vmem:[#allocation7 + $0x218] sm:$0xff]  ;;  %v622_v2 = vld [vmem:[#allocation7 + $0x200] sm:$0xff] }
  0xb9   : > { %810 = vmatpush1.msra.mxu1 %v560_v3  ;;  %740 = vmatprep.subr.mxu0 %v683_v4  ;;  %v624_v3 = vld [vmem:[#allocation7 + $0x210] sm:$0xff]  ;;  %v404_v4 = vlaneseq }
  0xba   : > { %811 = vmatprep.subr.mxu1 %v685_v5  ;;  %741 = vmatpush2.msra.mxu0 %v682_v6 }
  0xbb   : > { %812 = vmatpush2.msra.mxu1 %v684_v7  ;;  %742 = vmatprep.subr.mxu0 %v679_v8  ;;  %v405_v5 = vshrl.u32 %v404_v4, 7  ;;  %v402_v7 = vld [vmem:[%s1473_s2] sm:$0x3] }
  0xbc   : > { %813 = vmatprep.subr.mxu1 %v681_v9  ;;  %743 = vmatpush2.msra.mxu0 %v678_v10 }
  0xbd   : > { %814 = vmatpush2.msra.mxu1 %v680_v11  ;;  %744 = vmatprep.subr.mxu0 %v675_v12  ;;  %v406_v6 = vsub.s32 0, %v405_v5  ;;  %v410_v8 = vsub.s32 1, %v405_v5 }
  0xbe   : > { %815 = vmatprep.subr.mxu1 %v677_v13  ;;  %745 = vmatpush2.msra.mxu0 %v674_v14 }
  0xbf   : > { %816 = vmatpush2.msra.mxu1 %v676_v15  ;;  %746 = vmatprep.subr.mxu0 %v671_v16  ;;  %v407_v9 = vrot.slane %v402_v7, %v406_v6  ;;  %v411_v10 = vrot.slane %v402_v7, %v410_v8 }
  0xc0   : > { %817 = vmatprep.subr.mxu1 %v673_v17  ;;  %747 = vmatpush2.msra.mxu0 %v670_v18 }
  0xc1   : > { %818 = vmatpush2.msra.mxu1 %v672_v19  ;;  %748 = vmatprep.subr.mxu0 %v667_v20 }
  0xc2   : > { %819 = vmatprep.subr.mxu1 %v669_v21  ;;  %749 = vmatpush2.msra.mxu0 %v666_v22  ;;  %v698_v21 = vsub.s32 2, %v405_v5  ;;  %v686_v22 = vld [vmem:[%s1475_s4] sm:$0xf] }
  0xc3   : > { %820 = vmatpush2.msra.mxu1 %v668_v23  ;;  %750 = vmatprep.subr.mxu0 %v663_v24  ;;  %v702_v23 = vsub.s32 3, %v405_v5  ;;  %v691_v24 = vrot.slane %v686_v22, %v406_v6 }
  0xc4   : > { %821 = vmatprep.subr.mxu1 %v665_v25  ;;  %751 = vmatpush2.msra.mxu0 %v662_v26  ;;  %v699_v25 = vrot.slane %v686_v22, %v698_v21  ;;  %v695_v26 = vrot.slane %v686_v22, %v410_v8 }
  0xc5   : > { %822 = vmatpush2.msra.mxu1 %v664_v27  ;;  %752 = vmatprep.subr.mxu0 %v659_v28  ;;  %v703_v27 = vrot.slane %v686_v22, %v702_v23 }
  0xc6   : > { %823 = vmatprep.subr.mxu1 %v661_v29  ;;  %753 = vmatpush2.msra.mxu0 %v658_v30 }
  0xc7   : > { %824 = vmatpush2.msra.mxu1 %v660_v31  ;;  %754 = vmatprep.subr.mxu0 %v655_v32 }
  0xc8   : > { %825 = vmatprep.subr.mxu1 %v657_v33  ;;  %755 = vmatpush2.msra.mxu0 %v654_v34 }
  0xc9   : > { %826 = vmatpush2.msra.mxu1 %v656_v35  ;;  %756 = vmatprep.subr.mxu0 %v651_v36 }
  0xca   : > { %827 = vmatprep.subr.mxu1 %v653_v37  ;;  %757 = vmatpush2.msra.mxu0 %v650_v38 }
  0xcb   : > { %828 = vmatpush2.msra.mxu1 %v652_v39  ;;  %758 = vmatprep.subr.mxu0 %v647_v40 }
  0xcc   : > { %829 = vmatprep.subr.mxu1 %v649_v41  ;;  %759 = vmatpush2.msra.mxu0 %v646_v42 }
  0xcd   : > { %830 = vmatpush2.msra.mxu1 %v648_v43  ;;  %760 = vmatprep.subr.mxu0 %v643_v44 }
  0xce   : > { %831 = vmatprep.subr.mxu1 %v645_v45  ;;  %761 = vmatpush2.msra.mxu0 %v642_v46 }
  0xcf   : > { %832 = vmatpush2.msra.mxu1 %v644_v47  ;;  %762 = vmatprep.subr.mxu0 %v639_v48 }
  0xd0   : > { %833 = vmatprep.subr.mxu1 %v641_v49  ;;  %763 = vmatpush2.msra.mxu0 %v638_v50 }
  0xd1   : > { %834 = vmatpush2.msra.mxu1 %v640_v51  ;;  %764 = vmatprep.subr.mxu0 %v635_v52 }
  0xd2   : > { %835 = vmatprep.subr.mxu1 %v637_v53  ;;  %765 = vmatpush2.msra.mxu0 %v634_v54 }
  0xd3   : > { %836 = vmatpush2.msra.mxu1 %v636_v55  ;;  %766 = vmatprep.subr.mxu0 %v631_v56 }
  0xd4   : > { %837 = vmatprep.subr.mxu1 %v633_v57  ;;  %767 = vmatpush2.msra.mxu0 %v630_v58 }
  0xd5   : > { %838 = vmatpush2.msra.mxu1 %v632_v59  ;;  %768 = vmatprep.subr.mxu0 %v627_v60 }
  0xd6   : > { %839 = vmatprep.subr.mxu1 %v629_v61  ;;  %769 = vmatpush2.msra.mxu0 %v626_v62 }
  0xd7   : > { %840 = vmatpush2.msra.mxu1 %v628_v63  ;;  %770 = vmatprep.subr.mxu0 %v623_v0 }
  0xd8   : > { %841 = vmatprep.subr.mxu1 %v625_v1  ;;  %771 = vmatpush2.msra.mxu0 %v622_v2 }
  0xd9   : > { %842 = vmatpush2.msra.mxu1 %v624_v3 }
 0x158   : > { %v480_v11 = vpop.f32.mrf.mxu0 }
 0x159   : > { %v551_v12 = vpop.f32.mrf.mxu1  ;;  %v481_v13 = vadd.f32 %v480_v11, %v407_v9 }
 0x15a   : > { %v482_v14 = vpop.f32.mrf.mxu0 }
 0x15b   : > { %v483_v15 = vadd.f32 %v482_v14, %v411_v10  ;;  %v552_v16 = vadd.f32 %v551_v12, %v481_v13  ;;  %v553_v17 = vpop.f32.mrf.mxu1 }
 0x15d   : > { %v554_v18 = vadd.f32 %v553_v17, %v483_v15  ;;  %v556_v20 = vmax.f32 %v552_v16, 0.0 }
 0x15f   : > { %v557_v19 = vmax.f32 %v554_v18, 0.0 }
 0x161   : > { %772 = vmatprep.mubr.f32.mxu0 %v557_v19  ;;  %843 = vmatprep.mubr.f32.mxu1 %v557_v19 }
 0x162   : > { %773 = vmatmul.mubr.f32.vlgmr.msra.gmra.mxu0 %v556_v20  ;;  %844 = vmatmul.mubr.f32.vlgmr.msra.gmra.mxu1 %v556_v20 }
 0x222   : > { %v774_v28 = vpop.f32.mrf.mxu0  ;;  %v845_v29 = vpop.f32.mrf.mxu1 }
 0x223   : > { %v775_v30 = vadd.f32 %v774_v28, %v691_v24  ;;  %v846_v31 = vadd.f32 %v845_v29, %v699_v25 }
 0x224   : > { %v776_v32 = vpop.f32.mrf.mxu0  ;;  %v847_v33 = vpop.f32.mrf.mxu1 }
 0x225   : > { %v777_v34 = vadd.f32 %v776_v32, %v695_v26  ;;  %v848_v35 = vadd.f32 %v847_v33, %v703_v27  ;;  %v850_v36 = vmax.f32 %v775_v30, 0.0  ;;  %v852_v37 = vmax.f32 %v846_v31, 0.0 }
 0x227   : > { %v851_v38 = vmax.f32 %v777_v34, 0.0  ;;  %v853_v39 = vmax.f32 %v848_v35, 0.0 }
 0x229   : > { %v854_v40 = vmax.f32 %v850_v36, %v851_v38  ;;  %v855_v41 = vmax.f32 %v852_v37, %v853_v39 }
 0x22b   : > { %v856_v42 = vmax.f32 %v854_v40, %v855_v41 }
 0x22d   : > { %857 = vmax.xlane.f32.xlu0 %v856_v42 }
 0x2b6   : > { %v858_v43 = vpop.xlane.xlu0 %857 }
 0x2b7   : > { %v859_v44 = vsub.f32 %v850_v36, %v858_v43  ;;  %v860_v45 = vsub.f32 %v851_v38, %v858_v43  ;;  %v861_v46 = vsub.f32 %v852_v37, %v858_v43  ;;  %v862_v47 = vsub.f32 %v853_v39, %v858_v43 }
 0x2b9   : > { %v863_v48 = vmul.f32 1.442695, %v859_v44  ;;  %v865_v49 = vmul.f32 1.442695, %v860_v45  ;;  %v867_v50 = vmul.f32 1.442695, %v861_v46 }
 0x2ba   : > { %v869_v51 = vmul.f32 1.442695, %v862_v47 }
 0x2bb   : > { %1080 = vpow2.f32 %v863_v48 }
 0x2bc   : > { %1082 = vpow2.f32 %v865_v49 }
 0x2bd   : > { %1084 = vpow2.f32 %v867_v50 }
 0x2be   : > { %1086 = vpow2.f32 %v869_v51 }
 0x2c8   : > { %v1081_v52 = vpop.eup %1080 }
 0x2c9   : > { %v1083_v53 = vpop.eup %1082 }
 0x2ca   : > { %v871_v54 = vadd.f32 %v1083_v53, %v1081_v52  ;;  %v1085_v55 = vpop.eup %1084 }
 0x2cb   : > { %v1087_v57 = vpop.eup %1086 }
 0x2cc   : > { %v872_v56 = vadd.f32 %v1085_v55, %v871_v54 }
 0x2ce   : > { %v873_v58 = vadd.f32 %v1087_v57, %v872_v56 }
 0x2d0   : > { %874 = vadd.xlane.f32.xlu0 %v873_v58 }
 0x359   : > { %v875_v59 = vpop.xlane.xlu0 %874 }
 0x35a   : > { %1088 = vrcp.f32 %v875_v59 }
 0x367   : > { %v1089_v60 = vpop.eup %1088 }
 0x368   : > { %v877_v61 = vmul.f32 %v1089_v60, %v1081_v52  ;;  %v878_v62 = vmul.f32 %v1089_v60, %v1083_v53  ;;  %v879_v63 = vmul.f32 %v1089_v60, %v1085_v55  ;;  %v880_v0 = vmul.f32 %v1089_v60, %v1087_v57 }
 0x36a   : > { %881 = vst [vmem:[%s269_s14] sm:$0xff] %v877_v61  ;;  %882 = vst [vmem:[%s269_s14 + $0x8] sm:$0xff] %v878_v62 }
 0x36b   : > { %883 = vst [vmem:[%s269_s14 + $0x10] sm:$0xff] %v879_v63  ;;  %884 = vst [vmem:[%s269_s14 + $0x18] sm:$0xff] %v880_v0 }
 0x36c   : > { %1183 = shalt.err (!%p1180_p9)
}
 0x36d   : > { %s1184_s27 = scalar_lea.hbm %s1428_s29, 512  ;;  %s1188_s26 = scalar_lea.hbm %s1476_s5, 1024 }
 0x36e   : > { %p1185_p13 = scmp.ne.s32.totalorder %s1428_s29, %s1184_s27  ;;  %p1189_p4 = scmp.lt.s32.totalorder %s1428_s29, %s1476_s5 }
 0x36f   : > { %p1190_p8 = scmp.lt.s32.totalorder %s1188_s26, %s1184_s27 }
 0x370   : > { %p1186_p5 = pnand %p1185_p13, %p1492_p0 }
 0x371   : > { %p1191_p7 = por %p1190_p8, %p1189_p4 }
 0x372   : > { %p1187_p10 = pneg %p1186_p5 }
 0x374   : > { %p1192_p11 = pnand %p1191_p7, %p1187_p10 }
 0x376   : > { %1195 = shalt.err (!%p1192_p11)
}
 0x377   : > { %1019 = dma.vmem_to_hbm [thread:$0]  (%p1492_p0), %s1430_s6, 512, %s1428_s29, %s886_s22  }
 0x378 PF: > { %s912_s13 = sand.u32 1, %s1226_s18   ;;  %p1493_p1 = scmp.ne.s32.totalorder %s1482_s25, 0 }
 0x379   : > { %p1494_p2 = scmp.ge.s32.totalorder %s1238_s21, 2  ;;  %s913_s14 = scalar_lea.sflag [#allocation4], %s912_s13 }
 0x37b   : > { %p1033_p6 = pnand %p1494_p2, %p1493_p1 }
 0x37d   : > { %p1034_p12 = pneg %p1033_p6 }
 0x37f   : > { %1221 = dma.done.wait (%p1034_p12), %s913_s14, 512  }
 0x380   : > { %1223 = vsyncadd (%p1034_p12), %s913_s14, 4294966784  ;;  %p19_p3 = scmp.ge.s32.totalorder %s1350_s17, 4   ;;  %s1495_s18 = smov %s1230_s19 }
 0x381   : > { %s1496_s19 = smov %s1234_s20  ;;  %s1497_s20 = smov %s1359_s28 }
 0x382   : > { %s1498_s21 = smov %s1350_s17  ;;  %21 = sbr.rel (!%p19_p3) target bundleno = 6 (0x6), region = 93 }
 0x387   :  { %918 = vsyncpa [#allocation3], 1 }
 0x388   :  { %920 = vsyncpa [#allocation3 + $0x1], 1 }
 0x389   :  { %921 = vsyncpa [#allocation6], 1 }
 0x38a   :  { %922 = vsyncpa [#allocation4], 1 }
 0x38b   :  { %924 = vsyncpa [#allocation4 + $0x1], 1 }

// kernel: tpu_custom_call.1
= control target key start
LH: loop header
LB: loop body
LE: loop exit
PB: predicated region body
PF: predicated region fallthrough
CT: control target
= control target key end

     0   :  { %10 = vsyncpa [#allocation3], 0  ;;  %s1471_s0 = inlined_call_operand.hbm [shape: f32[16,512], index: 0, kind: input, shape index: {}]   ;;  %s1472_s1 = inlined_call_operand.hbm [shape: f32[512,256], index: 1, kind: input, shape index: {}]   ;;  %s1473_s2 = inlined_call_operand.vmem [shape: f32[1,256], index: 2, kind: input, shape index: {}]   ;;  %s1474_s3 = inlined_call_operand.hbm [shape: f32[256,512], index: 3, kind: input, shape index: {}]   ;;  %s1475_s4 = inlined_call_operand.vmem [shape: f32[1,512], index: 4, kind: input, shape index: {}]   ;;  %s1476_s5 = inlined_call_operand.hbm [shape: f32[16,512], index: 5, kind: output, shape index: {}]  }
   0x1   :  { %12 = vsyncpa [#allocation3 + $0x1], 0 }
   0x2   :  { %13 = vsyncpa [#allocation6], 0 }
   0x3   :  { %14 = vsyncpa [#allocation4], 0 }
   0x4   :  { %16 = vsyncpa [#allocation4 + $0x1], 0  ;;  %s1278_s18 = smov 0   ;;  %s1280_s19 = smov 0  }
   0x5   :  { %s1282_s20 = smov 0   ;;  %s1284_s21 = smov 0  }
   0x6 LB: > { %s1299_s22 = sadd.s32 4294967295, %s1238_s21   ;;  %s989_s23 = sadd.s32 4294967294, %s1238_s21   ;;  %s1238_s21 = sphi %s1284_s21, %s1498_s21   ;;  %s1234_s20 = sphi %s1282_s20, %s1497_s20   ;;  %s1230_s19 = sphi %s1280_s19, %s1496_s19   ;;  %s1226_s18 = sphi %s1278_s18, %s1495_s18  }
   0x7   : > { %p42_p0 = scmp.ne.s32.totalorder %s1230_s19, %s1226_s18  ;;  %p1477_p1 = scmp.eq.s32.totalorder %s1299_s22, 0 }
   0x8   : > { %p156_p3 = scmp.eq.s32.totalorder %s989_s23, 1  ;;  %p990_p5 = scmp.ge.s32.totalorder %s1238_s21, 1 }
   0x9   : > { %p1308_p4 = por %p1477_p1, %p42_p0  ;;  %p163_p7 = scmp.lt.s32.totalorder %s1238_s21, 3 }
   0xa   : > { %p1313_p6 = por %p156_p3, %p42_p0  ;;  %s1240_s27 = smov [#allocation5]  }
   0xb   : > { %s1481_s24 = scalar_select %p1308_p4, 1, 0 }
   0xc   : > { %s1482_s25 = scalar_select %p1313_p6, 1, 0 }
   0xd   : > { %p1318_p8 = pnand %p990_p5, %p163_p7  ;;  %s175_s28 = sshll.u32 %s1240_s27, 4  ;;  %s176_s28 = int_to_ptr.vmem [resolvable:$true] %s175_s28 }
   0xe   : > { %s1241_s30 = smov [#allocation7]   ;;  %s1101_s7 = scalar_lea.vmem %s176_s28, 16384 }
   0xf   : > { %s1483_s26 = scalar_select %p1318_p8, 1, 0 }
  0x10   : > { %p1021_p9 = pneg %p1318_p8  ;;  %s191_s6 = sshll.u32 %s1241_s30, 4  ;;  %s192_s6 = int_to_ptr.vmem [resolvable:$true] %s191_s6 }
  0x11   : > { %p1102_p13 = scmp.ne.s32.totalorder %s176_s28, %s1101_s7  ;;  %p1109_p5 = scmp.lt.s32.totalorder %s176_s28, %s176_s28 }
  0x12   : > { %p1327_p11 = pnand %p1021_p9, %p1477_p1  ;;  %p1110_p7 = scmp.lt.s32.totalorder %s1101_s7, %s1101_s7 }
  0x14   : > { %p1092_p12 = pneg %p1327_p11  ;;  %p1111_p10 = por %p1110_p7, %p1109_p5 }
  0x16   : > { %p1104_p0 = pnand %p1102_p13, %p1092_p12 }
  0x18   : > { %p1105_p3 = pneg %p1104_p0 }
  0x1a   : > { %p1112_p9 = pnand %p1111_p10, %p1105_p3 }
  0x1c   : > { %1115 = shalt.err (!%p1112_p9)
}
  0x1d   : > { %s1242_s8 = smov 256   ;;  %s1243_s9 = smov 16  }
  0x1e   : > { %1024 = dma.hbm_to_vmem [thread:$0]  (!%p1327_p11), %s1472_s1, 16384, %s176_s28, [#allocation6], %s1242_s8, %s1242_s8, %s1243_s9  }
  0x1f   : > { %s1127_s12 = scalar_lea.vmem %s192_s6, 16384  ;;  %p1135_p2 = scmp.lt.s32.totalorder %s192_s6, %s192_s6 }
  0x20   : > { %p1128_p1 = scmp.ne.s32.totalorder %s192_s6, %s1127_s12  ;;  %p1136_p6 = scmp.lt.s32.totalorder %s1127_s12, %s1127_s12 }
  0x22   : > { %p1130_p13 = pnand %p1128_p1, %p1092_p12  ;;  %p1137_p5 = por %p1136_p6, %p1135_p2 }
  0x24   : > { %p1131_p0 = pneg %p1130_p13 }
  0x26   : > { %p1138_p10 = pnand %p1137_p5, %p1131_p0 }
  0x28   : > { %1141 = shalt.err (!%p1138_p10)
}
  0x29   : > { %s1244_s13 = smov 512   ;;  %s1245_s14 = smov 32  }
  0x2a   : > { %1027 = dma.hbm_to_vmem [thread:$0]  (!%p1327_p11), %s1474_s3, 16384, %s192_s6, [#allocation6], %s1244_s13, %s1244_s13, %s1245_s14  }
  0x2b   : > { %s1350_s17 = sadd.s32 1, %s1238_s21   ;;  %s29_s27 = sadd.s32 1, %s1234_s20 }
  0x2c   : > { %s26_s23 = ssub.s32 %s1238_s21, %s1350_s17  ;;  %p36_p2 = scmp.ne.s32.totalorder %s1234_s20, %s1230_s19 }
  0x2d   : > { %p27_p1 = scmp.eq.s32.totalorder %s26_s23, 0  ;;  %p37_p6 = scmp.eq.s32.totalorder %s1238_s21, 0 }
  0x2e   : > { %p1485_p3 = scmp.eq.s32.totalorder %s1299_s22, 1  ;;  %p1038_p9 = scmp.lt.s32.totalorder %s1238_s21, 2 }
  0x2f   : > { %s1359_s28 = scalar_select %p27_p1, %s1234_s20, %s29_s27  }
  0x30   : > { %p38_p12 = por %p37_p6, %p36_p2  ;;  %p1363_p7 = por %p1485_p3, %p36_p2 }
  0x31   : > { %s208_s29 = sand.u32 1, %s1234_s20   ;;  %s1007_s6 = sshll.u32 %s1238_s21, 9 }
  0x32   : > { %s1486_s30 = scalar_select %p1363_p7, 1, 0 }
  0x33   : > { %s994_s7 = sshll.u32 %s208_s29, 5  ;;  %s1373_s10 = scalar_lea.hbm %s1471_s0, %s1007_s6 }
  0x34   : > { %s212_s11 = scalar_lea.vmem [#allocation2], %s994_s7  ;;  %p1375_p11 = pnand %p1038_p9, %p38_p12 }
  0x35   : > { %s220_s12 = sshll.u32 %s212_s11, 4  ;;  %s209_s14 = scalar_lea.sflag [#allocation3], %s208_s29  ;;  %s221_s12 = int_to_ptr.vmem [resolvable:$true] %s220_s12 }
  0x36   : > { %s1142_s15 = scalar_lea.hbm %s1373_s10, 512  ;;  %p1144_p0 = pneg %p1375_p11 }
  0x37   : > { %p1143_p13 = scmp.ne.s32.totalorder %s1373_s10, %s1142_s15  ;;  %s1147_s27 = scalar_lea.hbm %s1471_s0, 1024 }
  0x38   : > { %p1148_p1 = scmp.lt.s32.totalorder %s1373_s10, %s1471_s0  ;;  %p1149_p2 = scmp.lt.s32.totalorder %s1147_s27, %s1142_s15 }
  0x39   : > { %p1145_p5 = pnand %p1144_p0, %p1143_p13 }
  0x3a   : > { %p1150_p6 = por %p1149_p2, %p1148_p1 }
  0x3b   : > { %p1146_p10 = pneg %p1145_p5 }
  0x3d   : > { %p1151_p12 = pnand %p1150_p6, %p1146_p10 }
  0x3f   : > { %1154 = shalt.err (!%p1151_p12)
}
  0x40   : > { %s1155_s8 = scalar_lea.vmem %s221_s12, 512  ;;  %s1246_s29 = smov [#allocation2]  }
  0x41   : > { %p1156_p3 = scmp.ne.s32.totalorder %s221_s12, %s1155_s8  ;;  %s1160_s9 = sshll.u32 %s1246_s29, 4  ;;  %s1161_s9 = int_to_ptr.vmem [resolvable:$false] %s1160_s9 }
  0x42   : > { %s1162_s11 = scalar_lea.vmem %s1161_s9, 1024  ;;  %p1163_p13 = scmp.lt.s32.totalorder %s221_s12, %s1161_s9 }
  0x43   : > { %p1158_p9 = pnand %p1156_p3, %p1144_p0  ;;  %p1164_p5 = scmp.lt.s32.totalorder %s1162_s11, %s1155_s8 }
  0x45   : > { %p1159_p7 = pneg %p1158_p9  ;;  %p1165_p4 = por %p1164_p5, %p1163_p13 }
  0x47   : > { %p1166_p8 = pnand %p1165_p4, %p1159_p7 }
  0x49   : > { %1169 = shalt.err (!%p1166_p8)
}
  0x4a   : > { %1031 = dma.hbm_to_vmem [thread:$0]  (!%p1375_p11), %s1373_s10, 512, %s221_s12, %s209_s14  }
  0x4b   : > { %p1488_p10 = scmp.ne.s32.totalorder %s1483_s26, 0 }
  0x4c   : > { %s1396_s15 = sand.u32 (!%p1488_p10), 1, %s1230_s19   ;;  %p1489_p4 = scmp.ne.s32.totalorder (!%p1488_p10), %s1481_s24, 0 }
  0x4d   : > { %229 = sbr.rel (%p1488_p10) target bundleno = 888 (0x378), region = 40  ;;  %s998_s16 = sshll.u32 (!%p1488_p10), %s1396_s15, 5 }
  0x4e   : > { %s232_s23 = scalar_lea.sflag (!%p1488_p10), [#allocation3], %s1396_s15  ;;  %s1402_s27 = scalar_lea.vmem (!%p1488_p10), [#allocation2], %s998_s16 }
  0x52   : > { %1213 = dma.done.wait (%p1489_p4), %s232_s23, 512  }
  0x53   : > { %1215 = vsyncadd (%p1489_p4), %s232_s23, 4294966784  ;;  %p1490_p8 = scmp.eq.s32.totalorder %s1299_s22, 0 }
  0x55   : > { %1217 = dma.done.wait (%p1490_p8), [#allocation6], 32768   ;;  %p1491_p7 = pmov %p1490_p8 }
  0x56   : > { %v305_v0 = vld [vmem:[#allocation5 + $0xf8] sm:$0xff]  ;;  %v304_v2 = vld [vmem:[#allocation5 + $0xf0] sm:$0xff]  ;;  %v303_v4 = vld [vmem:[#allocation5 + $0xe8] sm:$0xff]  ;;  %s1008_s13 = sshll.u32 %s1299_s22, 9  ;;  %s269_s14 = scalar_lea.vmem [#allocation8], %s998_s16 }
  0x57   : > { %1219 = vsyncadd (%p1491_p7), [#allocation6], 4294934528  ;;  %v369_v1 = vld [vmem:[#allocation5 + $0x2f8] sm:$0xff]  ;;  %414 = vmatprep.subr.mxu0 %v305_v0  ;;  %v368_v3 = vld [vmem:[#allocation5 + $0x2f0] sm:$0xff]  ;;  %s900_s6 = sshll.u32 %s269_s14, 4  ;;  %s1428_s29 = scalar_lea.hbm %s1476_s5, %s1008_s13  ;;  %s1430_s6 = int_to_ptr.vmem [resolvable:$true] %s900_s6 }
  0x58   : > { %485 = vmatprep.subr.mxu1 %v369_v1  ;;  %v367_v5 = vld [vmem:[#allocation5 + $0x2e8] sm:$0xff]  ;;  %415 = vmatpush1.msra.mxu0 %v304_v2  ;;  %v302_v6 = vld [vmem:[#allocation5 + $0xe0] sm:$0xff]  ;;  %v301_v8 = vld [vmem:[#allocation5 + $0xd8] sm:$0xff]  ;;  %s886_s22 = scalar_lea.sflag [#allocation4], %s1396_s15  ;;  %s1170_s9 = scalar_lea.vmem %s1430_s6, 512 }
  0x59   : > { %486 = vmatpush1.msra.mxu1 %v368_v3  ;;  %v366_v7 = vld [vmem:[#allocation5 + $0x2e0] sm:$0xff]  ;;  %416 = vmatprep.subr.mxu0 %v303_v4  ;;  %v365_v9 = vld [vmem:[#allocation5 + $0x2d8] sm:$0xff]  ;;  %v300_v10 = vld [vmem:[#allocation5 + $0xd0] sm:$0xff]  ;;  %p1171_p11 = scmp.ne.s32.totalorder %s1430_s6, %s1170_s9  ;;  %p1492_p0 = scmp.ne.s32.totalorder %s1486_s30, 0 }
  0x5a   : > { %487 = vmatprep.subr.mxu1 %v367_v5  ;;  %v364_v11 = vld [vmem:[#allocation5 + $0x2d0] sm:$0xff]  ;;  %417 = vmatpush1.msra.mxu0 %v302_v6  ;;  %v299_v12 = vld [vmem:[#allocation5 + $0xc8] sm:$0xff]  ;;  %v298_v14 = vld [vmem:[#allocation5 + $0xc0] sm:$0xff]  ;;  %s1247_s11 = smov [#allocation8]  }
  0x5b   : > { %488 = vmatpush1.msra.mxu1 %v366_v7  ;;  %v363_v13 = vld [vmem:[#allocation5 + $0x2c8] sm:$0xff]  ;;  %418 = vmatprep.subr.mxu0 %v301_v8  ;;  %v362_v15 = vld [vmem:[#allocation5 + $0x2c0] sm:$0xff]  ;;  %v297_v16 = vld [vmem:[#allocation5 + $0xb8] sm:$0xff]  ;;  %p1172_p1 = pnand %p1171_p11, %p1492_p0  ;;  %s1174_s16 = sshll.u32 %s1247_s11, 4  ;;  %s1175_s16 = int_to_ptr.vmem [resolvable:$false] %s1174_s16 }
  0x5c   : > { %489 = vmatprep.subr.mxu1 %v365_v9  ;;  %419 = vmatpush1.msra.mxu0 %v300_v10  ;;  %v361_v17 = vld [vmem:[#allocation5 + $0x2b8] sm:$0xff]  ;;  %v296_v18 = vld [vmem:[#allocation5 + $0xb0] sm:$0xff]  ;;  %v295_v20 = vld [vmem:[#allocation5 + $0xa8] sm:$0xff]  ;;  %s1176_s23 = scalar_lea.vmem %s1175_s16, 1024  ;;  %p1177_p6 = scmp.lt.s32.totalorder %s1430_s6, %s1175_s16 }
  0x5d   : > { %490 = vmatpush1.msra.mxu1 %v364_v11  ;;  %420 = vmatprep.subr.mxu0 %v299_v12  ;;  %v360_v19 = vld [vmem:[#allocation5 + $0x2b0] sm:$0xff]  ;;  %v359_v21 = vld [vmem:[#allocation5 + $0x2a8] sm:$0xff]  ;;  %v294_v22 = vld [vmem:[#allocation5 + $0xa0] sm:$0xff]  ;;  %p1173_p2 = pneg %p1172_p1  ;;  %p1178_p12 = scmp.lt.s32.totalorder %s1176_s23, %s1170_s9 }
  0x5e   : > { %491 = vmatprep.subr.mxu1 %v363_v13  ;;  %421 = vmatpush1.msra.mxu0 %v298_v14  ;;  %v358_v23 = vld [vmem:[#allocation5 + $0x2a0] sm:$0xff]  ;;  %v293_v24 = vld [vmem:[#allocation5 + $0x98] sm:$0xff]  ;;  %v292_v26 = vld [vmem:[#allocation5 + $0x90] sm:$0xff] }
  0x5f   : > { %492 = vmatpush1.msra.mxu1 %v362_v15  ;;  %422 = vmatprep.subr.mxu0 %v297_v16  ;;  %v357_v25 = vld [vmem:[#allocation5 + $0x298] sm:$0xff]  ;;  %v356_v27 = vld [vmem:[#allocation5 + $0x290] sm:$0xff]  ;;  %v291_v28 = vld [vmem:[#allocation5 + $0x88] sm:$0xff]  ;;  %p1179_p3 = por %p1178_p12, %p1177_p6 }
  0x60   : > { %493 = vmatprep.subr.mxu1 %v361_v17  ;;  %423 = vmatpush1.msra.mxu0 %v296_v18  ;;  %v355_v29 = vld [vmem:[#allocation5 + $0x288] sm:$0xff]  ;;  %v290_v30 = vld [vmem:[#allocation5 + $0x80] sm:$0xff]  ;;  %v289_v32 = vld [vmem:[#allocation5 + $0x78] sm:$0xff] }
  0x61   : > { %494 = vmatpush1.msra.mxu1 %v360_v19  ;;  %424 = vmatprep.subr.mxu0 %v295_v20  ;;  %v354_v31 = vld [vmem:[#allocation5 + $0x280] sm:$0xff]  ;;  %v353_v33 = vld [vmem:[#allocation5 + $0x278] sm:$0xff]  ;;  %v288_v34 = vld [vmem:[#allocation5 + $0x70] sm:$0xff]  ;;  %p1180_p9 = pnand %p1179_p3, %p1173_p2 }
  0x62   : > { %495 = vmatprep.subr.mxu1 %v359_v21  ;;  %425 = vmatpush1.msra.mxu0 %v294_v22  ;;  %v352_v35 = vld [vmem:[#allocation5 + $0x270] sm:$0xff]  ;;  %v287_v36 = vld [vmem:[#allocation5 + $0x68] sm:$0xff]  ;;  %v286_v38 = vld [vmem:[#allocation5 + $0x60] sm:$0xff] }
  0x63   : > { %496 = vmatpush1.msra.mxu1 %v358_v23  ;;  %426 = vmatprep.subr.mxu0 %v293_v24  ;;  %v351_v37 = vld [vmem:[#allocation5 + $0x268] sm:$0xff]  ;;  %v350_v39 = vld [vmem:[#allocation5 + $0x260] sm:$0xff]  ;;  %v285_v40 = vld [vmem:[#allocation5 + $0x58] sm:$0xff] }
  0x64   : > { %497 = vmatprep.subr.mxu1 %v357_v25  ;;  %427 = vmatpush1.msra.mxu0 %v292_v26  ;;  %v349_v41 = vld [vmem:[#allocation5 + $0x258] sm:$0xff]  ;;  %v284_v42 = vld [vmem:[#allocation5 + $0x50] sm:$0xff]  ;;  %v283_v44 = vld [vmem:[#allocation5 + $0x48] sm:$0xff] }
  0x65   : > { %498 = vmatpush1.msra.mxu1 %v356_v27  ;;  %428 = vmatprep.subr.mxu0 %v291_v28  ;;  %v348_v43 = vld [vmem:[#allocation5 + $0x250] sm:$0xff]  ;;  %v347_v45 = vld [vmem:[#allocation5 + $0x248] sm:$0xff]  ;;  %v282_v46 = vld [vmem:[#allocation5 + $0x40] sm:$0xff] }
  0x66   : > { %499 = vmatprep.subr.mxu1 %v355_v29  ;;  %429 = vmatpush1.msra.mxu0 %v290_v30  ;;  %v346_v47 = vld [vmem:[#allocation5 + $0x240] sm:$0xff]  ;;  %v281_v48 = vld [vmem:[#allocation5 + $0x38] sm:$0xff]  ;;  %v280_v50 = vld [vmem:[#allocation5 + $0x30] sm:$0xff] }
  0x67   : > { %500 = vmatpush1.msra.mxu1 %v354_v31  ;;  %430 = vmatprep.subr.mxu0 %v289_v32  ;;  %v345_v49 = vld [vmem:[#allocation5 + $0x238] sm:$0xff]  ;;  %v344_v51 = vld [vmem:[#allocation5 + $0x230] sm:$0xff]  ;;  %v279_v52 = vld [vmem:[#allocation5 + $0x28] sm:$0xff] }
  0x68   : > { %501 = vmatprep.subr.mxu1 %v353_v33  ;;  %431 = vmatpush1.msra.mxu0 %v288_v34  ;;  %v343_v53 = vld [vmem:[#allocation5 + $0x228] sm:$0xff]  ;;  %v278_v54 = vld [vmem:[#allocation5 + $0x20] sm:$0xff]  ;;  %v277_v56 = vld [vmem:[#allocation5 + $0x18] sm:$0xff] }
  0x69   : > { %502 = vmatpush1.msra.mxu1 %v352_v35  ;;  %432 = vmatprep.subr.mxu0 %v287_v36  ;;  %v342_v55 = vld [vmem:[#allocation5 + $0x220] sm:$0xff]  ;;  %v341_v57 = vld [vmem:[#allocation5 + $0x218] sm:$0xff]  ;;  %v276_v58 = vld [vmem:[#allocation5 + $0x10] sm:$0xff] }
  0x6a   : > { %503 = vmatprep.subr.mxu1 %v351_v37  ;;  %433 = vmatpush1.msra.mxu0 %v286_v38  ;;  %v340_v59 = vld [vmem:[#allocation5 + $0x210] sm:$0xff]  ;;  %v275_v60 = vld [vmem:[#allocation5 + $0x8] sm:$0xff]  ;;  %v274_v62 = vld [vmem:[#allocation5] sm:$0xff] }
  0x6b   : > { %504 = vmatpush1.msra.mxu1 %v350_v39  ;;  %434 = vmatprep.subr.mxu0 %v285_v40  ;;  %v339_v61 = vld [vmem:[#allocation5 + $0x208] sm:$0xff]  ;;  %v338_v63 = vld [vmem:[#allocation5 + $0x200] sm:$0xff]  ;;  %v337_v0 = vld [vmem:[#allocation5 + $0x1f8] sm:$0xff] }
  0x6c   : > { %505 = vmatprep.subr.mxu1 %v349_v41  ;;  %435 = vmatpush1.msra.mxu0 %v284_v42  ;;  %v401_v1 = vld [vmem:[#allocation5 + $0x3f8] sm:$0xff]  ;;  %v336_v2 = vld [vmem:[#allocation5 + $0x1f0] sm:$0xff]  ;;  %v335_v4 = vld [vmem:[#allocation5 + $0x1e8] sm:$0xff] }
  0x6d   : > { %506 = vmatpush1.msra.mxu1 %v348_v43  ;;  %436 = vmatprep.subr.mxu0 %v283_v44  ;;  %v400_v3 = vld [vmem:[#allocation5 + $0x3f0] sm:$0xff]  ;;  %v399_v5 = vld [vmem:[#allocation5 + $0x3e8] sm:$0xff]  ;;  %v334_v6 = vld [vmem:[#allocation5 + $0x1e0] sm:$0xff] }
  0x6e   : > { %507 = vmatprep.subr.mxu1 %v347_v45  ;;  %437 = vmatpush1.msra.mxu0 %v282_v46  ;;  %v398_v7 = vld [vmem:[#allocation5 + $0x3e0] sm:$0xff]  ;;  %v333_v8 = vld [vmem:[#allocation5 + $0x1d8] sm:$0xff]  ;;  %v332_v10 = vld [vmem:[#allocation5 + $0x1d0] sm:$0xff] }
  0x6f   : > { %508 = vmatpush1.msra.mxu1 %v346_v47  ;;  %438 = vmatprep.subr.mxu0 %v281_v48  ;;  %v397_v9 = vld [vmem:[#allocation5 + $0x3d8] sm:$0xff]  ;;  %v396_v11 = vld [vmem:[#allocation5 + $0x3d0] sm:$0xff]  ;;  %v331_v12 = vld [vmem:[#allocation5 + $0x1c8] sm:$0xff] }
  0x70   : > { %509 = vmatprep.subr.mxu1 %v345_v49  ;;  %439 = vmatpush1.msra.mxu0 %v280_v50  ;;  %v395_v13 = vld [vmem:[#allocation5 + $0x3c8] sm:$0xff]  ;;  %v330_v14 = vld [vmem:[#allocation5 + $0x1c0] sm:$0xff]  ;;  %v329_v16 = vld [vmem:[#allocation5 + $0x1b8] sm:$0xff] }
  0x71   : > { %510 = vmatpush1.msra.mxu1 %v344_v51  ;;  %440 = vmatprep.subr.mxu0 %v279_v52  ;;  %v394_v15 = vld [vmem:[#allocation5 + $0x3c0] sm:$0xff]  ;;  %v393_v17 = vld [vmem:[#allocation5 + $0x3b8] sm:$0xff]  ;;  %v328_v18 = vld [vmem:[#allocation5 + $0x1b0] sm:$0xff] }
  0x72   : > { %511 = vmatprep.subr.mxu1 %v343_v53  ;;  %441 = vmatpush1.msra.mxu0 %v278_v54  ;;  %v392_v19 = vld [vmem:[#allocation5 + $0x3b0] sm:$0xff]  ;;  %v327_v20 = vld [vmem:[#allocation5 + $0x1a8] sm:$0xff]  ;;  %v326_v22 = vld [vmem:[#allocation5 + $0x1a0] sm:$0xff] }
  0x73   : > { %512 = vmatpush1.msra.mxu1 %v342_v55  ;;  %442 = vmatprep.subr.mxu0 %v277_v56  ;;  %v391_v21 = vld [vmem:[#allocation5 + $0x3a8] sm:$0xff]  ;;  %v390_v23 = vld [vmem:[#allocation5 + $0x3a0] sm:$0xff]  ;;  %v325_v24 = vld [vmem:[#allocation5 + $0x198] sm:$0xff] }
  0x74   : > { %513 = vmatprep.subr.mxu1 %v341_v57  ;;  %443 = vmatpush1.msra.mxu0 %v276_v58  ;;  %v389_v25 = vld [vmem:[#allocation5 + $0x398] sm:$0xff]  ;;  %v324_v26 = vld [vmem:[#allocation5 + $0x190] sm:$0xff]  ;;  %v323_v28 = vld [vmem:[#allocation5 + $0x188] sm:$0xff] }
  0x75   : > { %514 = vmatpush1.msra.mxu1 %v340_v59  ;;  %444 = vmatprep.subr.mxu0 %v275_v60  ;;  %v388_v27 = vld [vmem:[#allocation5 + $0x390] sm:$0xff]  ;;  %v387_v29 = vld [vmem:[#allocation5 + $0x388] sm:$0xff]  ;;  %v322_v30 = vld [vmem:[#allocation5 + $0x180] sm:$0xff] }
  0x76   : > { %515 = vmatprep.subr.mxu1 %v339_v61  ;;  %445 = vmatpush1.msra.mxu0 %v274_v62  ;;  %v386_v31 = vld [vmem:[#allocation5 + $0x380] sm:$0xff]  ;;  %v321_v32 = vld [vmem:[#allocation5 + $0x178] sm:$0xff]  ;;  %v320_v34 = vld [vmem:[#allocation5 + $0x170] sm:$0xff] }
  0x77   : > { %516 = vmatpush1.msra.mxu1 %v338_v63  ;;  %446 = vmatprep.subr.mxu0 %v337_v0  ;;  %v385_v33 = vld [vmem:[#allocation5 + $0x378] sm:$0xff]  ;;  %v384_v35 = vld [vmem:[#allocation5 + $0x370] sm:$0xff]  ;;  %v319_v36 = vld [vmem:[#allocation5 + $0x168] sm:$0xff] }
  0x78   : > { %517 = vmatprep.subr.mxu1 %v401_v1  ;;  %447 = vmatpush2.msra.mxu0 %v336_v2  ;;  %v383_v37 = vld [vmem:[#allocation5 + $0x368] sm:$0xff]  ;;  %v318_v38 = vld [vmem:[#allocation5 + $0x160] sm:$0xff]  ;;  %v317_v40 = vld [vmem:[#allocation5 + $0x158] sm:$0xff] }
  0x79   : > { %518 = vmatpush2.msra.mxu1 %v400_v3  ;;  %448 = vmatprep.subr.mxu0 %v335_v4  ;;  %v382_v39 = vld [vmem:[#allocation5 + $0x360] sm:$0xff]  ;;  %v381_v41 = vld [vmem:[#allocation5 + $0x358] sm:$0xff]  ;;  %v316_v42 = vld [vmem:[#allocation5 + $0x150] sm:$0xff] }
  0x7a   : > { %519 = vmatprep.subr.mxu1 %v399_v5  ;;  %449 = vmatpush2.msra.mxu0 %v334_v6  ;;  %v380_v43 = vld [vmem:[#allocation5 + $0x350] sm:$0xff]  ;;  %v315_v44 = vld [vmem:[#allocation5 + $0x148] sm:$0xff]  ;;  %v314_v46 = vld [vmem:[#allocation5 + $0x140] sm:$0xff] }
  0x7b   : > { %520 = vmatpush2.msra.mxu1 %v398_v7  ;;  %450 = vmatprep.subr.mxu0 %v333_v8  ;;  %v379_v45 = vld [vmem:[#allocation5 + $0x348] sm:$0xff]  ;;  %v378_v47 = vld [vmem:[#allocation5 + $0x340] sm:$0xff]  ;;  %v313_v48 = vld [vmem:[#allocation5 + $0x138] sm:$0xff] }
  0x7c   : > { %521 = vmatprep.subr.mxu1 %v397_v9  ;;  %451 = vmatpush2.msra.mxu0 %v332_v10  ;;  %v377_v49 = vld [vmem:[#allocation5 + $0x338] sm:$0xff]  ;;  %v312_v50 = vld [vmem:[#allocation5 + $0x130] sm:$0xff]  ;;  %v311_v52 = vld [vmem:[#allocation5 + $0x128] sm:$0xff] }
  0x7d   : > { %522 = vmatpush2.msra.mxu1 %v396_v11  ;;  %452 = vmatprep.subr.mxu0 %v331_v12  ;;  %v376_v51 = vld [vmem:[#allocation5 + $0x330] sm:$0xff]  ;;  %v375_v53 = vld [vmem:[#allocation5 + $0x328] sm:$0xff]  ;;  %v310_v54 = vld [vmem:[#allocation5 + $0x120] sm:$0xff] }
  0x7e   : > { %523 = vmatprep.subr.mxu1 %v395_v13  ;;  %453 = vmatpush2.msra.mxu0 %v330_v14  ;;  %v374_v55 = vld [vmem:[#allocation5 + $0x320] sm:$0xff]  ;;  %v309_v56 = vld [vmem:[#allocation5 + $0x118] sm:$0xff]  ;;  %v308_v58 = vld [vmem:[#allocation5 + $0x110] sm:$0xff] }
  0x7f   : > { %524 = vmatpush2.msra.mxu1 %v394_v15  ;;  %454 = vmatprep.subr.mxu0 %v329_v16  ;;  %v373_v57 = vld [vmem:[#allocation5 + $0x318] sm:$0xff]  ;;  %v372_v59 = vld [vmem:[#allocation5 + $0x310] sm:$0xff]  ;;  %v307_v60 = vld [vmem:[#allocation5 + $0x108] sm:$0xff] }
  0x80   : > { %525 = vmatprep.subr.mxu1 %v393_v17  ;;  %455 = vmatpush2.msra.mxu0 %v328_v18  ;;  %v371_v61 = vld [vmem:[#allocation5 + $0x308] sm:$0xff]  ;;  %v306_v62 = vld [vmem:[#allocation5 + $0x100] sm:$0xff]  ;;  %v273_v1 = vld [vmem:[%s1402_s27 + $0x18] sm:$0xff] }
  0x81   : > { %526 = vmatpush2.msra.mxu1 %v392_v19  ;;  %456 = vmatprep.subr.mxu0 %v327_v20  ;;  %v271_v63 = vld [vmem:[%s1402_s27 + $0x8] sm:$0xff]  ;;  %v370_v0 = vld [vmem:[#allocation5 + $0x300] sm:$0xff]  ;;  %v272_v3 = vld [vmem:[%s1402_s27 + $0x10] sm:$0xff] }
  0x82   : > { %527 = vmatprep.subr.mxu1 %v391_v21  ;;  %457 = vmatpush2.msra.mxu0 %v326_v22  ;;  %v270_v2 = vld [vmem:[%s1402_s27] sm:$0xff]  ;;  %v619_v4 = vld [vmem:[#allocation7 + $0x1e8] sm:$0xff]  ;;  %v621_v5 = vld [vmem:[#allocation7 + $0x1f8] sm:$0xff] }
  0x83   : > { %528 = vmatpush2.msra.mxu1 %v390_v23  ;;  %458 = vmatprep.subr.mxu0 %v325_v24  ;;  %v618_v6 = vld [vmem:[#allocation7 + $0x1e0] sm:$0xff]  ;;  %v620_v7 = vld [vmem:[#allocation7 + $0x1f0] sm:$0xff]  ;;  %v615_v8 = vld [vmem:[#allocation7 + $0x1c8] sm:$0xff] }
  0x84   : > { %529 = vmatprep.subr.mxu1 %v389_v25  ;;  %459 = vmatpush2.msra.mxu0 %v324_v26  ;;  %v617_v9 = vld [vmem:[#allocation7 + $0x1d8] sm:$0xff]  ;;  %v614_v10 = vld [vmem:[#allocation7 + $0x1c0] sm:$0xff]  ;;  %v616_v11 = vld [vmem:[#allocation7 + $0x1d0] sm:$0xff] }
  0x85   : > { %530 = vmatpush2.msra.mxu1 %v388_v27  ;;  %460 = vmatprep.subr.mxu0 %v323_v28  ;;  %v611_v12 = vld [vmem:[#allocation7 + $0x1a8] sm:$0xff]  ;;  %v613_v13 = vld [vmem:[#allocation7 + $0x1b8] sm:$0xff]  ;;  %v610_v14 = vld [vmem:[#allocation7 + $0x1a0] sm:$0xff] }
  0x86   : > { %531 = vmatprep.subr.mxu1 %v387_v29  ;;  %461 = vmatpush2.msra.mxu0 %v322_v30  ;;  %v612_v15 = vld [vmem:[#allocation7 + $0x1b0] sm:$0xff]  ;;  %v607_v16 = vld [vmem:[#allocation7 + $0x188] sm:$0xff]  ;;  %v609_v17 = vld [vmem:[#allocation7 + $0x198] sm:$0xff] }
  0x87   : > { %532 = vmatpush2.msra.mxu1 %v386_v31  ;;  %462 = vmatprep.subr.mxu0 %v321_v32  ;;  %v606_v18 = vld [vmem:[#allocation7 + $0x180] sm:$0xff]  ;;  %v608_v19 = vld [vmem:[#allocation7 + $0x190] sm:$0xff]  ;;  %v603_v20 = vld [vmem:[#allocation7 + $0x168] sm:$0xff] }
  0x88   : > { %533 = vmatprep.subr.mxu1 %v385_v33  ;;  %463 = vmatpush2.msra.mxu0 %v320_v34  ;;  %v605_v21 = vld [vmem:[#allocation7 + $0x178] sm:$0xff]  ;;  %v602_v22 = vld [vmem:[#allocation7 + $0x160] sm:$0xff]  ;;  %v604_v23 = vld [vmem:[#allocation7 + $0x170] sm:$0xff] }
  0x89   : > { %534 = vmatpush2.msra.mxu1 %v384_v35  ;;  %464 = vmatprep.subr.mxu0 %v319_v36  ;;  %v599_v24 = vld [vmem:[#allocation7 + $0x148] sm:$0xff]  ;;  %v601_v25 = vld [vmem:[#allocation7 + $0x158] sm:$0xff]  ;;  %v598_v26 = vld [vmem:[#allocation7 + $0x140] sm:$0xff] }
  0x8a   : > { %535 = vmatprep.subr.mxu1 %v383_v37  ;;  %465 = vmatpush2.msra.mxu0 %v318_v38  ;;  %v600_v27 = vld [vmem:[#allocation7 + $0x150] sm:$0xff]  ;;  %v595_v28 = vld [vmem:[#allocation7 + $0x128] sm:$0xff]  ;;  %v597_v29 = vld [vmem:[#allocation7 + $0x138] sm:$0xff] }
  0x8b   : > { %536 = vmatpush2.msra.mxu1 %v382_v39  ;;  %466 = vmatprep.subr.mxu0 %v317_v40  ;;  %v594_v30 = vld [vmem:[#allocation7 + $0x120] sm:$0xff]  ;;  %v596_v31 = vld [vmem:[#allocation7 + $0x130] sm:$0xff]  ;;  %v591_v32 = vld [vmem:[#allocation7 + $0x108] sm:$0xff] }
  0x8c   : > { %537 = vmatprep.subr.mxu1 %v381_v41  ;;  %467 = vmatpush2.msra.mxu0 %v316_v42  ;;  %v593_v33 = vld [vmem:[#allocation7 + $0x118] sm:$0xff]  ;;  %v590_v34 = vld [vmem:[#allocation7 + $0x100] sm:$0xff]  ;;  %v592_v35 = vld [vmem:[#allocation7 + $0x110] sm:$0xff] }
  0x8d   : > { %538 = vmatpush2.msra.mxu1 %v380_v43  ;;  %468 = vmatprep.subr.mxu0 %v315_v44  ;;  %v587_v36 = vld [vmem:[#allocation7 + $0xe8] sm:$0xff]  ;;  %v589_v37 = vld [vmem:[#allocation7 + $0xf8] sm:$0xff]  ;;  %v586_v38 = vld [vmem:[#allocation7 + $0xe0] sm:$0xff] }
  0x8e   : > { %539 = vmatprep.subr.mxu1 %v379_v45  ;;  %469 = vmatpush2.msra.mxu0 %v314_v46  ;;  %v588_v39 = vld [vmem:[#allocation7 + $0xf0] sm:$0xff]  ;;  %v583_v40 = vld [vmem:[#allocation7 + $0xc8] sm:$0xff]  ;;  %v585_v41 = vld [vmem:[#allocation7 + $0xd8] sm:$0xff] }
  0x8f   : > { %540 = vmatpush2.msra.mxu1 %v378_v47  ;;  %470 = vmatprep.subr.mxu0 %v313_v48  ;;  %v582_v42 = vld [vmem:[#allocation7 + $0xc0] sm:$0xff]  ;;  %v584_v43 = vld [vmem:[#allocation7 + $0xd0] sm:$0xff]  ;;  %v579_v44 = vld [vmem:[#allocation7 + $0xa8] sm:$0xff] }
  0x90   : > { %541 = vmatprep.subr.mxu1 %v377_v49  ;;  %471 = vmatpush2.msra.mxu0 %v312_v50  ;;  %v581_v45 = vld [vmem:[#allocation7 + $0xb8] sm:$0xff]  ;;  %v578_v46 = vld [vmem:[#allocation7 + $0xa0] sm:$0xff]  ;;  %v580_v47 = vld [vmem:[#allocation7 + $0xb0] sm:$0xff] }
  0x91   : > { %542 = vmatpush2.msra.mxu1 %v376_v51  ;;  %472 = vmatprep.subr.mxu0 %v311_v52  ;;  %v575_v48 = vld [vmem:[#allocation7 + $0x88] sm:$0xff]  ;;  %v577_v49 = vld [vmem:[#allocation7 + $0x98] sm:$0xff]  ;;  %v574_v50 = vld [vmem:[#allocation7 + $0x80] sm:$0xff] }
  0x92   : > { %543 = vmatprep.subr.mxu1 %v375_v53  ;;  %473 = vmatpush2.msra.mxu0 %v310_v54  ;;  %v576_v51 = vld [vmem:[#allocation7 + $0x90] sm:$0xff]  ;;  %v571_v52 = vld [vmem:[#allocation7 + $0x68] sm:$0xff]  ;;  %v573_v53 = vld [vmem:[#allocation7 + $0x78] sm:$0xff] }
  0x93   : > { %544 = vmatpush2.msra.mxu1 %v374_v55  ;;  %474 = vmatprep.subr.mxu0 %v309_v56  ;;  %v570_v54 = vld [vmem:[#allocation7 + $0x60] sm:$0xff]  ;;  %v572_v55 = vld [vmem:[#allocation7 + $0x70] sm:$0xff]  ;;  %v567_v56 = vld [vmem:[#allocation7 + $0x48] sm:$0xff] }
  0x94   : > { %545 = vmatprep.subr.mxu1 %v373_v57  ;;  %475 = vmatpush2.msra.mxu0 %v308_v58  ;;  %v569_v57 = vld [vmem:[#allocation7 + $0x58] sm:$0xff]  ;;  %v566_v58 = vld [vmem:[#allocation7 + $0x40] sm:$0xff] }
  0x95   : > { %546 = vmatpush2.msra.mxu1 %v372_v59  ;;  %476 = vmatprep.subr.mxu0 %v307_v60  ;;  %v568_v59 = vld [vmem:[#allocation7 + $0x50] sm:$0xff]  ;;  %v563_v60 = vld [vmem:[#allocation7 + $0x28] sm:$0xff] }
  0x96   : > { %547 = vmatprep.subr.mxu1 %v371_v61  ;;  %477 = vmatpush2.msra.mxu0 %v306_v62  ;;  %v565_v61 = vld [vmem:[#allocation7 + $0x38] sm:$0xff]  ;;  %v562_v62 = vld [vmem:[#allocation7 + $0x20] sm:$0xff] }
  0x97   : > { %478 = vmatprep.mubr.f32.mxu0 %v271_v63  ;;  %548 = vmatpush2.msra.mxu1 %v370_v0  ;;  %v564_v63 = vld [vmem:[#allocation7 + $0x30] sm:$0xff]  ;;  %v559_v0 = vld [vmem:[#allocation7 + $0x8] sm:$0xff] }
  0x98   : > { %549 = vmatprep.mubr.f32.mxu1 %v273_v1  ;;  %479 = vmatmul.mubr.f32.vlgmr.msra.gmra.mxu0 %v270_v2  ;;  %v561_v1 = vld [vmem:[#allocation7 + $0x18] sm:$0xff]  ;;  %v558_v2 = vld [vmem:[#allocation7] sm:$0xff] }
  0x99   : > { %550 = vmatmul.mubr.f32.vlgmr.msra.gmra.mxu1 %v272_v3  ;;  %708 = vmatprep.subr.mxu0 %v619_v4  ;;  %v560_v3 = vld [vmem:[#allocation7 + $0x10] sm:$0xff]  ;;  %v683_v4 = vld [vmem:[#allocation7 + $0x3e8] sm:$0xff] }
  0x9a   : > { %779 = vmatprep.subr.mxu1 %v621_v5  ;;  %709 = vmatpush1.msra.mxu0 %v618_v6  ;;  %v685_v5 = vld [vmem:[#allocation7 + $0x3f8] sm:$0xff]  ;;  %v682_v6 = vld [vmem:[#allocation7 + $0x3e0] sm:$0xff] }
  0x9b   : > { %780 = vmatpush1.msra.mxu1 %v620_v7  ;;  %710 = vmatprep.subr.mxu0 %v615_v8  ;;  %v684_v7 = vld [vmem:[#allocation7 + $0x3f0] sm:$0xff]  ;;  %v679_v8 = vld [vmem:[#allocation7 + $0x3c8] sm:$0xff] }
  0x9c   : > { %781 = vmatprep.subr.mxu1 %v617_v9  ;;  %711 = vmatpush1.msra.mxu0 %v614_v10  ;;  %v681_v9 = vld [vmem:[#allocation7 + $0x3d8] sm:$0xff]  ;;  %v678_v10 = vld [vmem:[#allocation7 + $0x3c0] sm:$0xff] }
  0x9d   : > { %782 = vmatpush1.msra.mxu1 %v616_v11  ;;  %712 = vmatprep.subr.mxu0 %v611_v12  ;;  %v680_v11 = vld [vmem:[#allocation7 + $0x3d0] sm:$0xff]  ;;  %v675_v12 = vld [vmem:[#allocation7 + $0x3a8] sm:$0xff] }
  0x9e   : > { %783 = vmatprep.subr.mxu1 %v613_v13  ;;  %713 = vmatpush1.msra.mxu0 %v610_v14  ;;  %v677_v13 = vld [vmem:[#allocation7 + $0x3b8] sm:$0xff]  ;;  %v674_v14 = vld [vmem:[#allocation7 + $0x3a0] sm:$0xff] }
  0x9f   : > { %784 = vmatpush1.msra.mxu1 %v612_v15  ;;  %714 = vmatprep.subr.mxu0 %v607_v16  ;;  %v676_v15 = vld [vmem:[#allocation7 + $0x3b0] sm:$0xff]  ;;  %v671_v16 = vld [vmem:[#allocation7 + $0x388] sm:$0xff] }
  0xa0   : > { %785 = vmatprep.subr.mxu1 %v609_v17  ;;  %715 = vmatpush1.msra.mxu0 %v606_v18  ;;  %v673_v17 = vld [vmem:[#allocation7 + $0x398] sm:$0xff]  ;;  %v670_v18 = vld [vmem:[#allocation7 + $0x380] sm:$0xff] }
  0xa1   : > { %786 = vmatpush1.msra.mxu1 %v608_v19  ;;  %716 = vmatprep.subr.mxu0 %v603_v20  ;;  %v672_v19 = vld [vmem:[#allocation7 + $0x390] sm:$0xff]  ;;  %v667_v20 = vld [vmem:[#allocation7 + $0x368] sm:$0xff] }
  0xa2   : > { %787 = vmatprep.subr.mxu1 %v605_v21  ;;  %717 = vmatpush1.msra.mxu0 %v602_v22  ;;  %v669_v21 = vld [vmem:[#allocation7 + $0x378] sm:$0xff]  ;;  %v666_v22 = vld [vmem:[#allocation7 + $0x360] sm:$0xff] }
  0xa3   : > { %788 = vmatpush1.msra.mxu1 %v604_v23  ;;  %718 = vmatprep.subr.mxu0 %v599_v24  ;;  %v668_v23 = vld [vmem:[#allocation7 + $0x370] sm:$0xff]  ;;  %v663_v24 = vld [vmem:[#allocation7 + $0x348] sm:$0xff] }
  0xa4   : > { %789 = vmatprep.subr.mxu1 %v601_v25  ;;  %719 = vmatpush1.msra.mxu0 %v598_v26  ;;  %v665_v25 = vld [vmem:[#allocation7 + $0x358] sm:$0xff]  ;;  %v662_v26 = vld [vmem:[#allocation7 + $0x340] sm:$0xff] }
  0xa5   : > { %790 = vmatpush1.msra.mxu1 %v600_v27  ;;  %720 = vmatprep.subr.mxu0 %v595_v28  ;;  %v664_v27 = vld [vmem:[#allocation7 + $0x350] sm:$0xff]  ;;  %v659_v28 = vld [vmem:[#allocation7 + $0x328] sm:$0xff] }
  0xa6   : > { %791 = vmatprep.subr.mxu1 %v597_v29  ;;  %721 = vmatpush1.msra.mxu0 %v594_v30  ;;  %v661_v29 = vld [vmem:[#allocation7 + $0x338] sm:$0xff]  ;;  %v658_v30 = vld [vmem:[#allocation7 + $0x320] sm:$0xff] }
  0xa7   : > { %792 = vmatpush1.msra.mxu1 %v596_v31  ;;  %722 = vmatprep.subr.mxu0 %v591_v32  ;;  %v660_v31 = vld [vmem:[#allocation7 + $0x330] sm:$0xff]  ;;  %v655_v32 = vld [vmem:[#allocation7 + $0x308] sm:$0xff] }
  0xa8   : > { %793 = vmatprep.subr.mxu1 %v593_v33  ;;  %723 = vmatpush1.msra.mxu0 %v590_v34  ;;  %v657_v33 = vld [vmem:[#allocation7 + $0x318] sm:$0xff]  ;;  %v654_v34 = vld [vmem:[#allocation7 + $0x300] sm:$0xff] }
  0xa9   : > { %794 = vmatpush1.msra.mxu1 %v592_v35  ;;  %724 = vmatprep.subr.mxu0 %v587_v36  ;;  %v656_v35 = vld [vmem:[#allocation7 + $0x310] sm:$0xff]  ;;  %v651_v36 = vld [vmem:[#allocation7 + $0x2e8] sm:$0xff] }
  0xaa   : > { %795 = vmatprep.subr.mxu1 %v589_v37  ;;  %725 = vmatpush1.msra.mxu0 %v586_v38  ;;  %v653_v37 = vld [vmem:[#allocation7 + $0x2f8] sm:$0xff]  ;;  %v650_v38 = vld [vmem:[#allocation7 + $0x2e0] sm:$0xff] }
  0xab   : > { %796 = vmatpush1.msra.mxu1 %v588_v39  ;;  %726 = vmatprep.subr.mxu0 %v583_v40  ;;  %v652_v39 = vld [vmem:[#allocation7 + $0x2f0] sm:$0xff]  ;;  %v647_v40 = vld [vmem:[#allocation7 + $0x2c8] sm:$0xff] }
  0xac   : > { %797 = vmatprep.subr.mxu1 %v585_v41  ;;  %727 = vmatpush1.msra.mxu0 %v582_v42  ;;  %v649_v41 = vld [vmem:[#allocation7 + $0x2d8] sm:$0xff]  ;;  %v646_v42 = vld [vmem:[#allocation7 + $0x2c0] sm:$0xff] }
  0xad   : > { %798 = vmatpush1.msra.mxu1 %v584_v43  ;;  %728 = vmatprep.subr.mxu0 %v579_v44  ;;  %v648_v43 = vld [vmem:[#allocation7 + $0x2d0] sm:$0xff]  ;;  %v643_v44 = vld [vmem:[#allocation7 + $0x2a8] sm:$0xff] }
  0xae   : > { %799 = vmatprep.subr.mxu1 %v581_v45  ;;  %729 = vmatpush1.msra.mxu0 %v578_v46  ;;  %v645_v45 = vld [vmem:[#allocation7 + $0x2b8] sm:$0xff]  ;;  %v642_v46 = vld [vmem:[#allocation7 + $0x2a0] sm:$0xff] }
  0xaf   : > { %800 = vmatpush1.msra.mxu1 %v580_v47  ;;  %730 = vmatprep.subr.mxu0 %v575_v48  ;;  %v644_v47 = vld [vmem:[#allocation7 + $0x2b0] sm:$0xff]  ;;  %v639_v48 = vld [vmem:[#allocation7 + $0x288] sm:$0xff] }
  0xb0   : > { %801 = vmatprep.subr.mxu1 %v577_v49  ;;  %731 = vmatpush1.msra.mxu0 %v574_v50  ;;  %v641_v49 = vld [vmem:[#allocation7 + $0x298] sm:$0xff]  ;;  %v638_v50 = vld [vmem:[#allocation7 + $0x280] sm:$0xff] }
  0xb1   : > { %802 = vmatpush1.msra.mxu1 %v576_v51  ;;  %732 = vmatprep.subr.mxu0 %v571_v52  ;;  %v640_v51 = vld [vmem:[#allocation7 + $0x290] sm:$0xff]  ;;  %v635_v52 = vld [vmem:[#allocation7 + $0x268] sm:$0xff] }
  0xb2   : > { %803 = vmatprep.subr.mxu1 %v573_v53  ;;  %733 = vmatpush1.msra.mxu0 %v570_v54  ;;  %v637_v53 = vld [vmem:[#allocation7 + $0x278] sm:$0xff]  ;;  %v634_v54 = vld [vmem:[#allocation7 + $0x260] sm:$0xff] }
  0xb3   : > { %804 = vmatpush1.msra.mxu1 %v572_v55  ;;  %734 = vmatprep.subr.mxu0 %v567_v56  ;;  %v636_v55 = vld [vmem:[#allocation7 + $0x270] sm:$0xff]  ;;  %v631_v56 = vld [vmem:[#allocation7 + $0x248] sm:$0xff] }
  0xb4   : > { %805 = vmatprep.subr.mxu1 %v569_v57  ;;  %735 = vmatpush1.msra.mxu0 %v566_v58  ;;  %v633_v57 = vld [vmem:[#allocation7 + $0x258] sm:$0xff]  ;;  %v630_v58 = vld [vmem:[#allocation7 + $0x240] sm:$0xff] }
  0xb5   : > { %806 = vmatpush1.msra.mxu1 %v568_v59  ;;  %736 = vmatprep.subr.mxu0 %v563_v60  ;;  %v632_v59 = vld [vmem:[#allocation7 + $0x250] sm:$0xff]  ;;  %v627_v60 = vld [vmem:[#allocation7 + $0x228] sm:$0xff] }
  0xb6   : > { %807 = vmatprep.subr.mxu1 %v565_v61  ;;  %737 = vmatpush1.msra.mxu0 %v562_v62  ;;  %v629_v61 = vld [vmem:[#allocation7 + $0x238] sm:$0xff]  ;;  %v626_v62 = vld [vmem:[#allocation7 + $0x220] sm:$0xff] }
  0xb7   : > { %808 = vmatpush1.msra.mxu1 %v564_v63  ;;  %738 = vmatprep.subr.mxu0 %v559_v0  ;;  %v628_v63 = vld [vmem:[#allocation7 + $0x230] sm:$0xff]  ;;  %v623_v0 = vld [vmem:[#allocation7 + $0x208] sm:$0xff] }
  0xb8   : > { %809 = vmatprep.subr.mxu1 %v561_v1  ;;  %739 = vmatpush1.msra.mxu0 %v558_v2  ;;  %v625_v1 = vld [vmem:[#allocation7 + $0x218] sm:$0xff]  ;;  %v622_v2 = vld [vmem:[#allocation7 + $0x200] sm:$0xff] }
  0xb9   : > { %810 = vmatpush1.msra.mxu1 %v560_v3  ;;  %740 = vmatprep.subr.mxu0 %v683_v4  ;;  %v624_v3 = vld [vmem:[#allocation7 + $0x210] sm:$0xff]  ;;  %v404_v4 = vlaneseq }
  0xba   : > { %811 = vmatprep.subr.mxu1 %v685_v5  ;;  %741 = vmatpush2.msra.mxu0 %v682_v6 }
  0xbb   : > { %812 = vmatpush2.msra.mxu1 %v684_v7  ;;  %742 = vmatprep.subr.mxu0 %v679_v8  ;;  %v405_v5 = vshrl.u32 %v404_v4, 7  ;;  %v402_v7 = vld [vmem:[%s1473_s2] sm:$0x3] }
  0xbc   : > { %813 = vmatprep.subr.mxu1 %v681_v9  ;;  %743 = vmatpush2.msra.mxu0 %v678_v10 }
  0xbd   : > { %814 = vmatpush2.msra.mxu1 %v680_v11  ;;  %744 = vmatprep.subr.mxu0 %v675_v12  ;;  %v406_v6 = vsub.s32 0, %v405_v5  ;;  %v410_v8 = vsub.s32 1, %v405_v5 }
  0xbe   : > { %815 = vmatprep.subr.mxu1 %v677_v13  ;;  %745 = vmatpush2.msra.mxu0 %v674_v14 }
  0xbf   : > { %816 = vmatpush2.msra.mxu1 %v676_v15  ;;  %746 = vmatprep.subr.mxu0 %v671_v16  ;;  %v407_v9 = vrot.slane %v402_v7, %v406_v6  ;;  %v411_v10 = vrot.slane %v402_v7, %v410_v8 }
  0xc0   : > { %817 = vmatprep.subr.mxu1 %v673_v17  ;;  %747 = vmatpush2.msra.mxu0 %v670_v18 }
  0xc1   : > { %818 = vmatpush2.msra.mxu1 %v672_v19  ;;  %748 = vmatprep.subr.mxu0 %v667_v20 }
  0xc2   : > { %819 = vmatprep.subr.mxu1 %v669_v21  ;;  %749 = vmatpush2.msra.mxu0 %v666_v22  ;;  %v698_v21 = vsub.s32 2, %v405_v5  ;;  %v686_v22 = vld [vmem:[%s1475_s4] sm:$0xf] }
  0xc3   : > { %820 = vmatpush2.msra.mxu1 %v668_v23  ;;  %750 = vmatprep.subr.mxu0 %v663_v24  ;;  %v702_v23 = vsub.s32 3, %v405_v5  ;;  %v691_v24 = vrot.slane %v686_v22, %v406_v6 }
  0xc4   : > { %821 = vmatprep.subr.mxu1 %v665_v25  ;;  %751 = vmatpush2.msra.mxu0 %v662_v26  ;;  %v699_v25 = vrot.slane %v686_v22, %v698_v21  ;;  %v695_v26 = vrot.slane %v686_v22, %v410_v8 }
  0xc5   : > { %822 = vmatpush2.msra.mxu1 %v664_v27  ;;  %752 = vmatprep.subr.mxu0 %v659_v28  ;;  %v703_v27 = vrot.slane %v686_v22, %v702_v23 }
  0xc6   : > { %823 = vmatprep.subr.mxu1 %v661_v29  ;;  %753 = vmatpush2.msra.mxu0 %v658_v30 }
  0xc7   : > { %824 = vmatpush2.msra.mxu1 %v660_v31  ;;  %754 = vmatprep.subr.mxu0 %v655_v32 }
  0xc8   : > { %825 = vmatprep.subr.mxu1 %v657_v33  ;;  %755 = vmatpush2.msra.mxu0 %v654_v34 }
  0xc9   : > { %826 = vmatpush2.msra.mxu1 %v656_v35  ;;  %756 = vmatprep.subr.mxu0 %v651_v36 }
  0xca   : > { %827 = vmatprep.subr.mxu1 %v653_v37  ;;  %757 = vmatpush2.msra.mxu0 %v650_v38 }
  0xcb   : > { %828 = vmatpush2.msra.mxu1 %v652_v39  ;;  %758 = vmatprep.subr.mxu0 %v647_v40 }
  0xcc   : > { %829 = vmatprep.subr.mxu1 %v649_v41  ;;  %759 = vmatpush2.msra.mxu0 %v646_v42 }
  0xcd   : > { %830 = vmatpush2.msra.mxu1 %v648_v43  ;;  %760 = vmatprep.subr.mxu0 %v643_v44 }
  0xce   : > { %831 = vmatprep.subr.mxu1 %v645_v45  ;;  %761 = vmatpush2.msra.mxu0 %v642_v46 }
  0xcf   : > { %832 = vmatpush2.msra.mxu1 %v644_v47  ;;  %762 = vmatprep.subr.mxu0 %v639_v48 }
  0xd0   : > { %833 = vmatprep.subr.mxu1 %v641_v49  ;;  %763 = vmatpush2.msra.mxu0 %v638_v50 }
  0xd1   : > { %834 = vmatpush2.msra.mxu1 %v640_v51  ;;  %764 = vmatprep.subr.mxu0 %v635_v52 }
  0xd2   : > { %835 = vmatprep.subr.mxu1 %v637_v53  ;;  %765 = vmatpush2.msra.mxu0 %v634_v54 }
  0xd3   : > { %836 = vmatpush2.msra.mxu1 %v636_v55  ;;  %766 = vmatprep.subr.mxu0 %v631_v56 }
  0xd4   : > { %837 = vmatprep.subr.mxu1 %v633_v57  ;;  %767 = vmatpush2.msra.mxu0 %v630_v58 }
  0xd5   : > { %838 = vmatpush2.msra.mxu1 %v632_v59  ;;  %768 = vmatprep.subr.mxu0 %v627_v60 }
  0xd6   : > { %839 = vmatprep.subr.mxu1 %v629_v61  ;;  %769 = vmatpush2.msra.mxu0 %v626_v62 }
  0xd7   : > { %840 = vmatpush2.msra.mxu1 %v628_v63  ;;  %770 = vmatprep.subr.mxu0 %v623_v0 }
  0xd8   : > { %841 = vmatprep.subr.mxu1 %v625_v1  ;;  %771 = vmatpush2.msra.mxu0 %v622_v2 }
  0xd9   : > { %842 = vmatpush2.msra.mxu1 %v624_v3 }
 0x158   : > { %v480_v11 = vpop.f32.mrf.mxu0 }
 0x159   : > { %v551_v12 = vpop.f32.mrf.mxu1  ;;  %v481_v13 = vadd.f32 %v480_v11, %v407_v9 }
 0x15a   : > { %v482_v14 = vpop.f32.mrf.mxu0 }
 0x15b   : > { %v483_v15 = vadd.f32 %v482_v14, %v411_v10  ;;  %v552_v16 = vadd.f32 %v551_v12, %v481_v13  ;;  %v553_v17 = vpop.f32.mrf.mxu1 }
 0x15d   : > { %v554_v18 = vadd.f32 %v553_v17, %v483_v15  ;;  %v556_v20 = vmax.f32 %v552_v16, 0.0 }
 0x15f   : > { %v557_v19 = vmax.f32 %v554_v18, 0.0 }
 0x161   : > { %772 = vmatprep.mubr.f32.mxu0 %v557_v19  ;;  %843 = vmatprep.mubr.f32.mxu1 %v557_v19 }
 0x162   : > { %773 = vmatmul.mubr.f32.vlgmr.msra.gmra.mxu0 %v556_v20  ;;  %844 = vmatmul.mubr.f32.vlgmr.msra.gmra.mxu1 %v556_v20 }
 0x222   : > { %v774_v28 = vpop.f32.mrf.mxu0  ;;  %v845_v29 = vpop.f32.mrf.mxu1 }
 0x223   : > { %v775_v30 = vadd.f32 %v774_v28, %v691_v24  ;;  %v846_v31 = vadd.f32 %v845_v29, %v699_v25 }
 0x224   : > { %v776_v32 = vpop.f32.mrf.mxu0  ;;  %v847_v33 = vpop.f32.mrf.mxu1 }
 0x225   : > { %v777_v34 = vadd.f32 %v776_v32, %v695_v26  ;;  %v848_v35 = vadd.f32 %v847_v33, %v703_v27  ;;  %v850_v36 = vmax.f32 %v775_v30, 0.0  ;;  %v852_v37 = vmax.f32 %v846_v31, 0.0 }
 0x227   : > { %v851_v38 = vmax.f32 %v777_v34, 0.0  ;;  %v853_v39 = vmax.f32 %v848_v35, 0.0 }
 0x229   : > { %v854_v40 = vmax.f32 %v850_v36, %v851_v38  ;;  %v855_v41 = vmax.f32 %v852_v37, %v853_v39 }
 0x22b   : > { %v856_v42 = vmax.f32 %v854_v40, %v855_v41 }
 0x22d   : > { %857 = vmax.xlane.f32.xlu0 %v856_v42 }
 0x2b6   : > { %v858_v43 = vpop.xlane.xlu0 %857 }
 0x2b7   : > { %v859_v44 = vsub.f32 %v850_v36, %v858_v43  ;;  %v860_v45 = vsub.f32 %v851_v38, %v858_v43  ;;  %v861_v46 = vsub.f32 %v852_v37, %v858_v43  ;;  %v862_v47 = vsub.f32 %v853_v39, %v858_v43 }
 0x2b9   : > { %v863_v48 = vmul.f32 1.442695, %v859_v44  ;;  %v865_v49 = vmul.f32 1.442695, %v860_v45  ;;  %v867_v50 = vmul.f32 1.442695, %v861_v46 }
 0x2ba   : > { %v869_v51 = vmul.f32 1.442695, %v862_v47 }
 0x2bb   : > { %1080 = vpow2.f32 %v863_v48 }
 0x2bc   : > { %1082 = vpow2.f32 %v865_v49 }
 0x2bd   : > { %1084 = vpow2.f32 %v867_v50 }
 0x2be   : > { %1086 = vpow2.f32 %v869_v51 }
 0x2c8   : > { %v1081_v52 = vpop.eup %1080 }
 0x2c9   : > { %v1083_v53 = vpop.eup %1082 }
 0x2ca   : > { %v871_v54 = vadd.f32 %v1083_v53, %v1081_v52  ;;  %v1085_v55 = vpop.eup %1084 }
 0x2cb   : > { %v1087_v57 = vpop.eup %1086 }
 0x2cc   : > { %v872_v56 = vadd.f32 %v1085_v55, %v871_v54 }
 0x2ce   : > { %v873_v58 = vadd.f32 %v1087_v57, %v872_v56 }
 0x2d0   : > { %874 = vadd.xlane.f32.xlu0 %v873_v58 }
 0x359   : > { %v875_v59 = vpop.xlane.xlu0 %874 }
 0x35a   : > { %1088 = vrcp.f32 %v875_v59 }
 0x367   : > { %v1089_v60 = vpop.eup %1088 }
 0x368   : > { %v877_v61 = vmul.f32 %v1089_v60, %v1081_v52  ;;  %v878_v62 = vmul.f32 %v1089_v60, %v1083_v53  ;;  %v879_v63 = vmul.f32 %v1089_v60, %v1085_v55  ;;  %v880_v0 = vmul.f32 %v1089_v60, %v1087_v57 }
 0x36a   : > { %881 = vst [vmem:[%s269_s14] sm:$0xff] %v877_v61  ;;  %882 = vst [vmem:[%s269_s14 + $0x8] sm:$0xff] %v878_v62 }
 0x36b   : > { %883 = vst [vmem:[%s269_s14 + $0x10] sm:$0xff] %v879_v63  ;;  %884 = vst [vmem:[%s269_s14 + $0x18] sm:$0xff] %v880_v0 }
 0x36c   : > { %1183 = shalt.err (!%p1180_p9)
}
 0x36d   : > { %s1184_s27 = scalar_lea.hbm %s1428_s29, 512  ;;  %s1188_s26 = scalar_lea.hbm %s1476_s5, 1024 }
 0x36e   : > { %p1185_p13 = scmp.ne.s32.totalorder %s1428_s29, %s1184_s27  ;;  %p1189_p4 = scmp.lt.s32.totalorder %s1428_s29, %s1476_s5 }
 0x36f   : > { %p1190_p8 = scmp.lt.s32.totalorder %s1188_s26, %s1184_s27 }
 0x370   : > { %p1186_p5 = pnand %p1185_p13, %p1492_p0 }
 0x371   : > { %p1191_p7 = por %p1190_p8, %p1189_p4 }
 0x372   : > { %p1187_p10 = pneg %p1186_p5 }
 0x374   : > { %p1192_p11 = pnand %p1191_p7, %p1187_p10 }
 0x376   : > { %1195 = shalt.err (!%p1192_p11)
}
 0x377   : > { %1019 = dma.vmem_to_hbm [thread:$0]  (%p1492_p0), %s1430_s6, 512, %s1428_s29, %s886_s22  }
 0x378 PF: > { %s912_s13 = sand.u32 1, %s1226_s18   ;;  %p1493_p1 = scmp.ne.s32.totalorder %s1482_s25, 0 }
 0x379   : > { %p1494_p2 = scmp.ge.s32.totalorder %s1238_s21, 2  ;;  %s913_s14 = scalar_lea.sflag [#allocation4], %s912_s13 }
 0x37b   : > { %p1033_p6 = pnand %p1494_p2, %p1493_p1 }
 0x37d   : > { %p1034_p12 = pneg %p1033_p6 }
 0x37f   : > { %1221 = dma.done.wait (%p1034_p12), %s913_s14, 512  }
 0x380   : > { %1223 = vsyncadd (%p1034_p12), %s913_s14, 4294966784  ;;  %p19_p3 = scmp.ge.s32.totalorder %s1350_s17, 4   ;;  %s1495_s18 = smov %s1230_s19 }
 0x381   : > { %s1496_s19 = smov %s1234_s20  ;;  %s1497_s20 = smov %s1359_s28 }
 0x382   : > { %s1498_s21 = smov %s1350_s17  ;;  %21 = sbr.rel (!%p19_p3) target bundleno = 6 (0x6), region = 93 }
 0x387   :  { %918 = vsyncpa [#allocation3], 1 }
 0x388   :  { %920 = vsyncpa [#allocation3 + $0x1], 1 }
 0x389   :  { %921 = vsyncpa [#allocation6], 1 }
 0x38a   :  { %922 = vsyncpa [#allocation4], 1 }
 0x38b   :  { %924 = vsyncpa [#allocation4 + $0x1], 1 }

</bundles_post_ra>
